<compile_context>
chip_gen: v6e
topology: v6e:2x2x1
jax: 0.10.0
libtpu: 0.0.40
codegen_flags: <defaults>
</compile_context>

<pallas_src>
import functools

import jax
import jax.numpy as jnp
from jax import lax
from jax.experimental import pallas as pl
from jax.experimental.pallas import tpu as pltpu


# ---------------------------------------------------------------------------
# Fused kernel: im2col-conv(3x3) + ReLU + global-avg-pool + Linear-ReLU-Linear
#               + L2 normalize, for TB batch elements per grid step.
# ---------------------------------------------------------------------------
def _fused_simclr_kernel(p_ref, wk_ref, bc_ref, w1_ref, b1_ref, w2_ref, b2_ref,
                         o_ref, *, TB, HW, KKCin, inv_hw):
    # p_ref  : (TB, H*W, K*K*Cin) bf16   im2col patches for TB images
    # wk_ref : (K*K*Cin, Cout)    bf16   conv weight (tap-major, channel-minor)
    # bc_ref : (1, Cout)          f32
    # w1_ref : (Cout, hidden)     bf16
    # b1_ref : (1, hidden)        f32
    # w2_ref : (hidden, out_dim)  bf16
    # b2_ref : (1, out_dim)       f32
    # o_ref  : (TB, out_dim)      f32

    # --- conv as ONE MXU matmul over all TB*H*W pixels (K = K*K*Cin = 36) ---
    patches = p_ref[...].reshape(TB * HW, KKCin)                      # bf16
    conv = jnp.dot(patches, wk_ref[...],
                   preferred_element_type=jnp.float32)                # (TB*HW, Cout) f32
    conv = jnp.maximum(conv + bc_ref[...], 0.0)                       # bias + ReLU

    # --- global average pool over spatial -> (TB, Cout) ---
    pooled = jnp.sum(conv.reshape(TB, HW, -1), axis=1) * inv_hw       # f32

    # --- projection head: Linear -> ReLU -> Linear (bf16 MXU, f32 accumulate) ---
    z1 = jnp.dot(pooled.astype(jnp.bfloat16), w1_ref[...],
                 preferred_element_type=jnp.float32) + b1_ref[...]    # (TB, hidden)
    z1 = jnp.maximum(z1, 0.0)
    z = jnp.dot(z1.astype(jnp.bfloat16), w2_ref[...],
                preferred_element_type=jnp.float32) + b2_ref[...]     # (TB, out_dim)

    # --- F.normalize(z, dim=1): z / max(||z||, 1e-12) == z * rsqrt(max(ss, 1e-24)) ---
    ss = jnp.sum(z * z, axis=1, keepdims=True)
    o_ref[...] = z * lax.rsqrt(jnp.maximum(ss, 1e-24))


# ---------------------------------------------------------------------------
# SimCLR forward (JAX glue: layout transpose, pad, im2col, dtype casts)
# ---------------------------------------------------------------------------
def simclr_forward(x_nchw, params):
    B, Cin, H, W = x_nchw.shape
    K = 3
    HW = H * W
    KKCin = K * K * Cin
    Cout = params["w_conv"].shape[-1]
    hidden = params["w1"].shape[1]
    out_dim = params["w2"].shape[1]

    # Batch tile: fills MXU rows for the head matmuls while keeping VMEM modest
    # (~10 MiB at TB=128 with H=W=16) -> safe on v5e/v6e/v7x alike.
    TB = min(B, 128)
    steps = -(-B // TB)          # ceil(B / TB)
    B_pad = steps * TB

    # NCHW -> NHWC, pad=1 (SAME), im2col -> (B, H*W, K*K*Cin) bf16 (lane-dense-ish
    # minor axis of 36 instead of Cin=4).
    x = jnp.transpose(x_nchw, (0, 2, 3, 1))
    xp = jnp.pad(x, ((0, 0), (1, 1), (1, 1), (0, 0)))
    taps = [xp[:, kh:kh + H, kw:kw + W, :] for kh in range(K) for kw in range(K)]
    patches = jnp.stack(taps, axis=3)                    # (B, H, W, K*K, Cin)
    patches = patches.reshape(B, HW, KKCin).astype(jnp.bfloat16)
    if B_pad != B:
        patches = jnp.pad(patches, ((0, B_pad - B), (0, 0), (0, 0)))

    # Conv weight (K, K, Cin, Cout) -> (K*K*Cin, Cout): same (kh, kw, cin) flatten
    # order as the patches above.
    wk = params["w_conv"].reshape(KKCin, Cout).astype(jnp.bfloat16)
    bc = params["b_conv"].reshape(1, Cout).astype(jnp.float32)
    w1 = params["w1"].astype(jnp.bfloat16)
    b1 = params["b1"].reshape(1, hidden).astype(jnp.float32)
    w2 = params["w2"].astype(jnp.bfloat16)
    b2 = params["b2"].reshape(1, out_dim).astype(jnp.float32)

    kernel = functools.partial(_fused_simclr_kernel,
                               TB=TB, HW=HW, KKCin=KKCin, inv_hw=1.0 / HW)

    def const_spec(shape):
        # Full-array block, constant index map -> weights stay resident in VMEM
        # (Pallas skips re-DMA when the block index does not change).
        return pl.BlockSpec(shape, lambda i, _n=len(shape): (0,) * _n)

    z = pl.pallas_call(
        kernel,
        out_shape=jax.ShapeDtypeStruct((B_pad, out_dim), jnp.float32),
        grid_spec=pltpu.PrefetchScalarGridSpec(
            num_scalar_prefetch=0,
            grid=(steps,),
            in_specs=[
                pl.BlockSpec((TB, HW, KKCin), lambda i: (i, 0, 0)),   # im2col patches
                const_spec((KKCin, Cout)),                            # conv w
                const_spec((1, Cout)),                                # conv b
                const_spec((Cout, hidden)),                           # w1
                const_spec((1, hidden)),                              # b1
                const_spec((hidden, out_dim)),                        # w2
                const_spec((1, out_dim)),                             # b2
            ],
            out_specs=pl.BlockSpec((TB, out_dim), lambda i: (i, 0)),  # lane+sublane dense
        ),
        compiler_params=pltpu.CompilerParams(
            dimension_semantics=("parallel",),       # batch tiles shard across TCs (v7x)
            vmem_limit_bytes=32 * 1024 * 1024,       # valid on v5e/v6e/v7x
        ),
    )(patches, wk, bc, w1, b1, w2, b2)

    return z[:B]


def init_params(key, cin=4, cout=32, hidden=2048, out_dim=128):
    ks = jax.random.split(key, 6)
    scale = 0.05
    return {
        "w_conv": scale * jax.random.normal(ks[0], (3, 3, cin, cout), jnp.float32),
        "b_conv": scale * jax.random.normal(ks[1], (cout,), jnp.float32),
        "w1": scale * jax.random.normal(ks[2], (cout, hidden), jnp.float32),
        "b1": scale * jax.random.normal(ks[3], (hidden,), jnp.float32),
        "w2": scale * jax.random.normal(ks[4], (hidden, out_dim), jnp.float32),
        "b2": scale * jax.random.normal(ks[5], (out_dim,), jnp.float32),
    }


def simclr_reference(x_nchw, params):
    """Pure-JAX f32 reference (same math, no bf16 casts)."""
    B, Cin, H, W = x_nchw.shape
    x = jnp.transpose(x_nchw, (0, 2, 3, 1))
    xp = jnp.pad(x, ((0, 0), (1, 1), (1, 1), (0, 0)))
    taps = [xp[:, kh:kh + H, kw:kw + W, :] for kh in range(3) for kw in range(3)]
    patches = jnp.stack(taps, axis=3).reshape(B, H * W, 9 * Cin)
    wk = params["w_conv"].reshape(9 * Cin, -1)
    conv = jnp.maximum(jnp.einsum("bpk,kc->bpc", patches, wk) + params["b_conv"], 0.0)
    h = jnp.mean(conv, axis=1)
    z1 = jnp.maximum(h @ params["w1"] + params["b1"], 0.0)
    z = z1 @ params["w2"] + params["b2"]
    n = jnp.maximum(jnp.linalg.norm(z, axis=1, keepdims=True), 1e-12)
    return z / n


if __name__ == "__main__":
    key = jax.random.PRNGKey(0)
    k_x, k_p = jax.random.split(key)

    B, Cin, H, W = 2, 4, 16, 16
    x = jax.random.normal(k_x, (B, Cin, H, W), jnp.float32)   # NCHW like PyTorch
    params = init_params(k_p, cin=Cin, cout=32, hidden=2048, out_dim=128)

    z = jax.jit(simclr_forward)(x, params)
    z = jax.block_until_ready(z)

    assert z.shape == (B, 128)
    # F.normalize(dim=1) => rows must be unit-norm
    norms = jnp.linalg.norm(z, axis=1)
    assert jnp.allclose(norms, 1.0, atol=1e-3), norms

    # Loose agreement with the f32 reference (kernel uses bf16 MXU operands).
    z_ref = simclr_reference(x, params)
    assert jnp.allclose(z, z_ref, atol=5e-2), float(jnp.max(jnp.abs(z - z_ref)))

    # TODO(synk): generic torchvision base_model backbones (e.g. ResNet) are not
    # reimplemented; the synthetic conv+ReLU+GAP encoder stands in for encoder().
    print("KERNEL_OK")
</pallas_src>

<mosaic_0001>
module attributes {stable_mosaic.version = 11 : i64} {
  func.func @_fused_simclr_kernel(%arg0: i32, %arg1: memref<2x256x36xbf16, #tpu.memory_space<vmem>>, %arg2: memref<36x32xbf16, #tpu.memory_space<vmem>>, %arg3: memref<1x32xf32, #tpu.memory_space<vmem>>, %arg4: memref<32x2048xbf16, #tpu.memory_space<vmem>>, %arg5: memref<1x2048xf32, #tpu.memory_space<vmem>>, %arg6: memref<2048x128xbf16, #tpu.memory_space<vmem>>, %arg7: memref<1x128xf32, #tpu.memory_space<vmem>>, %arg8: memref<2x128xf32, #tpu.memory_space<vmem>>) attributes {dimension_semantics = [#tpu.dimension_semantics<parallel>], iteration_bounds = array<i64: 1>, scalar_prefetch = 0 : i64, scratch_operands = 0 : i64, tpu.core_type = #tpu.core_type<tc>, window_params = [{transform_indices = @transform_0, window_bounds = array<i64: 2, 256, 36>}, {pipeline_mode = #tpu.pipeline_mode<synchronous>, transform_indices = @transform_1, window_bounds = array<i64: 36, 32>}, {pipeline_mode = #tpu.pipeline_mode<synchronous>, transform_indices = @transform_2, window_bounds = array<i64: 1, 32>}, {pipeline_mode = #tpu.pipeline_mode<synchronous>, transform_indices = @transform_3, window_bounds = array<i64: 32, 2048>}, {pipeline_mode = #tpu.pipeline_mode<synchronous>, transform_indices = @transform_4, window_bounds = array<i64: 1, 2048>}, {pipeline_mode = #tpu.pipeline_mode<synchronous>, transform_indices = @transform_5, window_bounds = array<i64: 2048, 128>}, {pipeline_mode = #tpu.pipeline_mode<synchronous>, transform_indices = @transform_6, window_bounds = array<i64: 1, 128>}, {transform_indices = @transform_7, window_bounds = array<i64: 2, 128>}]} {
    %c0 = arith.constant 0 : index
    %c0_0 = arith.constant 0 : index
    %c0_1 = arith.constant 0 : index
    %0 = vector.load %arg1[%c0, %c0_0, %c0_1] : memref<2x256x36xbf16, #tpu.memory_space<vmem>>, vector<2x256x36xbf16>
    %1 = vector.shape_cast %0 : vector<2x256x36xbf16> to vector<512x36xbf16>
    %c0_2 = arith.constant 0 : index
    %c0_3 = arith.constant 0 : index
    %2 = vector.load %arg2[%c0_2, %c0_3] : memref<36x32xbf16, #tpu.memory_space<vmem>>, vector<36x32xbf16>
    %cst = arith.constant dense<0.000000e+00> : vector<512x32xf32>
    %3 = tpu.matmul %1, %2, %cst {dimension_numbers = #tpu.dot_dimension_numbers<[1], [0], [0], [1], [0, 0, 1, 1], [], []>} : vector<512x36xbf16>, vector<36x32xbf16>, vector<512x32xf32> -> vector<512x32xf32>
    %c0_4 = arith.constant 0 : index
    %c0_5 = arith.constant 0 : index
    %4 = vector.load %arg3[%c0_4, %c0_5] : memref<1x32xf32, #tpu.memory_space<vmem>>, vector<1x32xf32>
    %5 = vector.broadcast %4 : vector<1x32xf32> to vector<512x32xf32>
    %6 = arith.addf %3, %5 : vector<512x32xf32>
    %cst_6 = arith.constant 0.000000e+00 : f32
    %7 = vector.broadcast %cst_6 : f32 to vector<512x32xf32>
    %8 = arith.maximumf %6, %7 : vector<512x32xf32>
    %9 = vector.shape_cast %8 : vector<512x32xf32> to vector<2x256x32xf32>
    %cst_7 = arith.constant dense<0.000000e+00> : vector<2x32xf32>
    %10 = vector.multi_reduction <add>, %9, %cst_7 [1] : vector<2x256x32xf32> to vector<2x32xf32>
    %cst_8 = arith.constant 3.906250e-03 : f32
    %11 = vector.broadcast %cst_8 : f32 to vector<2x32xf32>
    %12 = arith.mulf %10, %11 : vector<2x32xf32>
    %13 = arith.truncf %12 : vector<2x32xf32> to vector<2x32xbf16>
    %c0_9 = arith.constant 0 : index
    %c0_10 = arith.constant 0 : index
    %14 = vector.load %arg4[%c0_9, %c0_10] : memref<32x2048xbf16, #tpu.memory_space<vmem>>, vector<32x2048xbf16>
    %cst_11 = arith.constant dense<0.000000e+00> : vector<2x2048xf32>
    %15 = tpu.matmul %13, %14, %cst_11 {dimension_numbers = #tpu.dot_dimension_numbers<[1], [0], [0], [1], [0, 0, 1, 1], [], []>} : vector<2x32xbf16>, vector<32x2048xbf16>, vector<2x2048xf32> -> vector<2x2048xf32>
    %c0_12 = arith.constant 0 : index
    %c0_13 = arith.constant 0 : index
    %16 = vector.load %arg5[%c0_12, %c0_13] : memref<1x2048xf32, #tpu.memory_space<vmem>>, vector<1x2048xf32>
    %17 = vector.broadcast %16 : vector<1x2048xf32> to vector<2x2048xf32>
    %18 = arith.addf %15, %17 : vector<2x2048xf32>
    %cst_14 = arith.constant 0.000000e+00 : f32
    %19 = vector.broadcast %cst_14 : f32 to vector<2x2048xf32>
    %20 = arith.maximumf %18, %19 : vector<2x2048xf32>
    %21 = arith.truncf %20 : vector<2x2048xf32> to vector<2x2048xbf16>
    %c0_15 = arith.constant 0 : index
    %c0_16 = arith.constant 0 : index
    %22 = vector.load %arg6[%c0_15, %c0_16] : memref<2048x128xbf16, #tpu.memory_space<vmem>>, vector<2048x128xbf16>
    %cst_17 = arith.constant dense<0.000000e+00> : vector<2x128xf32>
    %23 = tpu.matmul %21, %22, %cst_17 {dimension_numbers = #tpu.dot_dimension_numbers<[1], [0], [0], [1], [0, 0, 1, 1], [], []>} : vector<2x2048xbf16>, vector<2048x128xbf16>, vector<2x128xf32> -> vector<2x128xf32>
    %c0_18 = arith.constant 0 : index
    %c0_19 = arith.constant 0 : index
    %24 = vector.load %arg7[%c0_18, %c0_19] : memref<1x128xf32, #tpu.memory_space<vmem>>, vector<1x128xf32>
    %25 = vector.broadcast %24 : vector<1x128xf32> to vector<2x128xf32>
    %26 = arith.addf %23, %25 : vector<2x128xf32>
    %27 = arith.mulf %26, %26 : vector<2x128xf32>
    %cst_20 = arith.constant dense<0.000000e+00> : vector<2xf32>
    %28 = vector.multi_reduction <add>, %27, %cst_20 [1] : vector<2x128xf32> to vector<2xf32>
    %29 = vector.shape_cast %28 : vector<2xf32> to vector<2x1xf32>
    %cst_21 = arith.constant 1.000000e-24 : f32
    %30 = vector.broadcast %cst_21 : f32 to vector<2x1xf32>
    %31 = arith.maximumf %29, %30 : vector<2x1xf32>
    %32 = math.rsqrt %31 : vector<2x1xf32>
    %33 = vector.broadcast %32 : vector<2x1xf32> to vector<2x128xf32>
    %34 = arith.mulf %26, %33 : vector<2x128xf32>
    %c0_22 = arith.constant 0 : index
    %c0_23 = arith.constant 0 : index
    %35 = vector.load %arg8[%c0_22, %c0_23] : memref<2x128xf32, #tpu.memory_space<vmem>>, vector<2x128xf32>
    tpu.vector_store %arg8[%c0_22, %c0_23], %34 {strides = array<i32>} : memref<2x128xf32, #tpu.memory_space<vmem>>, vector<2x128xf32>,
    return
  }
  func.func @transform_0(%arg0: i32) -> (i32, i32, i32) {
    %c0_i32 = arith.constant 0 : i32
    %c0_i32_0 = arith.constant 0 : i32
    %c0_i32_1 = arith.constant 0 : i32
    return %arg0, %c0_i32, %c0_i32_0 : i32, i32, i32
  }
  func.func @transform_1(%arg0: i32) -> (i32, i32) {
    %c0_i32 = arith.constant 0 : i32
    %c0_i32_0 = arith.constant 0 : i32
    %c0_i32_1 = arith.constant 0 : i32
    return %c0_i32, %c0_i32_0 : i32, i32
  }
  func.func @transform_2(%arg0: i32) -> (i32, i32) {
    %c0_i32 = arith.constant 0 : i32
    %c0_i32_0 = arith.constant 0 : i32
    %c0_i32_1 = arith.constant 0 : i32
    return %c0_i32, %c0_i32_0 : i32, i32
  }
  func.func @transform_3(%arg0: i32) -> (i32, i32) {
    %c0_i32 = arith.constant 0 : i32
    %c0_i32_0 = arith.constant 0 : i32
    %c0_i32_1 = arith.constant 0 : i32
    return %c0_i32, %c0_i32_0 : i32, i32
  }
  func.func @transform_4(%arg0: i32) -> (i32, i32) {
    %c0_i32 = arith.constant 0 : i32
    %c0_i32_0 = arith.constant 0 : i32
    %c0_i32_1 = arith.constant 0 : i32
    return %c0_i32, %c0_i32_0 : i32, i32
  }
  func.func @transform_5(%arg0: i32) -> (i32, i32) {
    %c0_i32 = arith.constant 0 : i32
    %c0_i32_0 = arith.constant 0 : i32
    %c0_i32_1 = arith.constant 0 : i32
    return %c0_i32, %c0_i32_0 : i32, i32
  }
  func.func @transform_6(%arg0: i32) -> (i32, i32) {
    %c0_i32 = arith.constant 0 : i32
    %c0_i32_0 = arith.constant 0 : i32
    %c0_i32_1 = arith.constant 0 : i32
    return %c0_i32, %c0_i32_0 : i32, i32
  }
  func.func @transform_7(%arg0: i32) -> (i32, i32) {
    %c0_i32 = arith.constant 0 : i32
    %c0_i32_0 = arith.constant 0 : i32
    return %arg0, %c0_i32 : i32, i32
  }
}

</mosaic_0001>

<bundles_post_ra>
// kernel: simclr_forward.1
= control target key start
LH: loop header
LB: loop body
LE: loop exit
PB: predicated region body
PF: predicated region fallthrough
CT: control target
= control target key end

     0   :  { %vm376_vm0 = vcmask 1041408   ;;  %vm279_vm1 = vcmask 293888   ;;  %s4543_s0 = inlined_call_operand.vmem [shape: bf16[2,256,36], index: 0, kind: input, shape index: {}]   ;;  %s4544_s1 = inlined_call_operand.vmem [shape: bf16[36,32], index: 1, kind: input, shape index: {}]   ;;  %s4545_s2 = inlined_call_operand.vmem [shape: f32[1,32], index: 2, kind: input, shape index: {}]   ;;  %s4546_s3 = inlined_call_operand.vmem [shape: bf16[32,2048], index: 3, kind: input, shape index: {}]   ;;  %s4547_s4 = inlined_call_operand.vmem [shape: f32[1,2048], index: 4, kind: input, shape index: {}]   ;;  %s4548_s5 = inlined_call_operand.vmem [shape: bf16[2048,128], index: 5, kind: input, shape index: {}]   ;;  %s4549_s6 = inlined_call_operand.vmem [shape: f32[1,128], index: 6, kind: input, shape index: {}]   ;;  %s4550_s7 = inlined_call_operand.hbm [shape: f32[2,128], index: 7, kind: output, shape index: {}]  }
   0x1   :  { %v3416_v0 = vld [vmem:[%s4544_s1 + $0x10] ss:$0 sps:$4 sm:$0x33]   ;;  %v3417_v1 = vld [vmem:[%s4544_s1 + $0x8] sm:$0xff]   ;;  %v3419_v3 = vld [vmem:[%s4543_s0] sm:$0xff]  }
   0x2   :  { %3413 = vmatprep.subr.msk.bf16.mxu0 %vm376_vm0, %v3416_v0  ;;  %v378_v2 = vsel %vm376_vm0, %v3416_v0, 0  ;;  %v3418_v4 = vld [vmem:[%s4544_s1] sm:$0xff]   ;;  %3349 = vmatprep.mubr.msk.bf16.mxu0 %vm279_vm1, %v3419_v3  ;;  %v3420_v5 = vld [vmem:[%s4543_s0 + $0x8] sm:$0xff]   ;;  %v3421_v6 = vld [vmem:[%s4543_s0 + $0x10] sm:$0xff]  }
   0x3   :  { %3344 = vmatpush3.bf16.msra.mxu0 %v378_v2  ;;  %v3422_v7 = vld [vmem:[%s4543_s0 + $0x18] sm:$0xff]   ;;  %v3423_v8 = vld [vmem:[%s4543_s0 + $0x20] sm:$0xff]   ;;  %v3424_v9 = vld [vmem:[%s4543_s0 + $0x28] sm:$0xff]  }
   0x4   :  { %3345 = vmatprep.subr.bf16.mxu0 %v3417_v1  ;;  %v3425_v10 = vld [vmem:[%s4543_s0 + $0x30] sm:$0xff]   ;;  %v3426_v11 = vld [vmem:[%s4543_s0 + $0x38] sm:$0xff]   ;;  %v3427_v12 = vld [vmem:[%s4543_s0 + $0x40] sm:$0xff]  }
   0x5   :  { %v3428_v13 = vld [vmem:[%s4543_s0 + $0x48] sm:$0xff]   ;;  %v3429_v14 = vld [vmem:[%s4543_s0 + $0x50] sm:$0xff]   ;;  %v3430_v15 = vld [vmem:[%s4543_s0 + $0x58] sm:$0xff]  }
   0x6   :  { %v3431_v16 = vld [vmem:[%s4543_s0 + $0x60] sm:$0xff]   ;;  %v3432_v17 = vld [vmem:[%s4543_s0 + $0x68] sm:$0xff]   ;;  %v3433_v18 = vld [vmem:[%s4543_s0 + $0x70] sm:$0xff]  }
   0x7   :  { %3346 = vmatpush3.bf16.msra.mxu0 %v3417_v1  ;;  %v3434_v19 = vld [vmem:[%s4543_s0 + $0x78] sm:$0xff]   ;;  %v3435_v20 = vld [vmem:[%s4543_s0 + $0x80] sm:$0xff]   ;;  %v3436_v21 = vld [vmem:[%s4543_s0 + $0x88] sm:$0xff]  }
   0x8   :  { %3347 = vmatprep.subr.bf16.mxu0 %v3418_v4  ;;  %v3437_v22 = vld [vmem:[%s4543_s0 + $0x90] sm:$0xff]   ;;  %v3438_v23 = vld [vmem:[%s4543_s0 + $0x98] sm:$0xff]   ;;  %v3439_v24 = vld [vmem:[%s4543_s0 + $0xa0] sm:$0xff]  }
   0x9   :  { %v3440_v25 = vld [vmem:[%s4543_s0 + $0xa8] sm:$0xff]   ;;  %v3441_v26 = vld [vmem:[%s4543_s0 + $0xb0] sm:$0xff]   ;;  %v3442_v27 = vld [vmem:[%s4543_s0 + $0xb8] sm:$0xff]  }
   0xa   :  { %v3443_v28 = vld [vmem:[%s4543_s0 + $0xc0] sm:$0xff]   ;;  %v3444_v29 = vld [vmem:[%s4543_s0 + $0xc8] sm:$0xff]   ;;  %v3445_v30 = vld [vmem:[%s4543_s0 + $0xd0] sm:$0xff]  }
   0xb   :  { %3348 = vmatpush3.bf16.msra.mxu0 %v3418_v4  ;;  %v3446_v31 = vld [vmem:[%s4543_s0 + $0xd8] sm:$0xff]   ;;  %v3447_v32 = vld [vmem:[%s4543_s0 + $0xe0] sm:$0xff]  }
   0xe   :  { %3350 = vmatmul.mubr.msk.bf16.vlgmr.msra.gmra.mxu0 %vm279_vm1, %v3420_v5 }
   0xf   :  { %3353 = vmatprep.mubr.msk.bf16.mxu0 %vm279_vm1, %v3421_v6 }
  0x16   :  { %3354 = vmatmul.mubr.msk.bf16.gmra.mxu0 %vm279_vm1, %v3422_v7 }
  0x17   :  { %3357 = vmatprep.mubr.msk.bf16.mxu0 %vm279_vm1, %v3423_v8 }
  0x1e   :  { %3358 = vmatmul.mubr.msk.bf16.gmra.mxu0 %vm279_vm1, %v3424_v9 }
  0x1f   :  { %3361 = vmatprep.mubr.msk.bf16.mxu0 %vm279_vm1, %v3425_v10 }
  0x26   :  { %3362 = vmatmul.mubr.msk.bf16.gmra.mxu0 %vm279_vm1, %v3426_v11 }
  0x27   :  { %3365 = vmatprep.mubr.msk.bf16.mxu0 %vm279_vm1, %v3427_v12 }
  0x2e   :  { %3366 = vmatmul.mubr.msk.bf16.gmra.mxu0 %vm279_vm1, %v3428_v13 }
  0x2f   :  { %3369 = vmatprep.mubr.msk.bf16.mxu0 %vm279_vm1, %v3429_v14 }
  0x36   :  { %3370 = vmatmul.mubr.msk.bf16.gmra.mxu0 %vm279_vm1, %v3430_v15 }
  0x37   :  { %3373 = vmatprep.mubr.msk.bf16.mxu0 %vm279_vm1, %v3431_v16 }
  0x3e   :  { %3374 = vmatmul.mubr.msk.bf16.gmra.mxu0 %vm279_vm1, %v3432_v17 }
  0x3f   :  { %3377 = vmatprep.mubr.msk.bf16.mxu0 %vm279_vm1, %v3433_v18 }
  0x46   :  { %3378 = vmatmul.mubr.msk.bf16.gmra.mxu0 %vm279_vm1, %v3434_v19 }
  0x47   :  { %3381 = vmatprep.mubr.msk.bf16.mxu0 %vm279_vm1, %v3435_v20 }
  0x4e   :  { %3382 = vmatmul.mubr.msk.bf16.gmra.mxu0 %vm279_vm1, %v3436_v21 }
  0x4f   :  { %3385 = vmatprep.mubr.msk.bf16.mxu0 %vm279_vm1, %v3437_v22 }
  0x56   :  { %3386 = vmatmul.mubr.msk.bf16.gmra.mxu0 %vm279_vm1, %v3438_v23 }
  0x57   :  { %3389 = vmatprep.mubr.msk.bf16.mxu0 %vm279_vm1, %v3439_v24 }
  0x5e   :  { %3390 = vmatmul.mubr.msk.bf16.gmra.mxu0 %vm279_vm1, %v3440_v25 }
  0x5f   :  { %3393 = vmatprep.mubr.msk.bf16.mxu0 %vm279_vm1, %v3441_v26 }
  0x66   :  { %3394 = vmatmul.mubr.msk.bf16.gmra.mxu0 %vm279_vm1, %v3442_v27 }
  0x67   :  { %3397 = vmatprep.mubr.msk.bf16.mxu0 %vm279_vm1, %v3443_v28 }
  0x6e   :  { %3398 = vmatmul.mubr.msk.bf16.gmra.mxu0 %vm279_vm1, %v3444_v29 }
  0x6f   :  { %3401 = vmatprep.mubr.msk.bf16.mxu0 %vm279_vm1, %v3445_v30 }
  0x76   :  { %3402 = vmatmul.mubr.msk.bf16.gmra.mxu0 %vm279_vm1, %v3446_v31 }
  0x77   :  { %3405 = vmatprep.mubr.msk.bf16.mxu0 %vm279_vm1, %v3447_v32 }
  0x78   :  { %12 = vsyncpa [#allocation3], 0  ;;  %v3448_v33 = vld [vmem:[%s4543_s0 + $0xe8] sm:$0xff]   ;;  %v3449_v34 = vld [vmem:[%s4543_s0 + $0xf0] sm:$0xff]   ;;  %vm733_vm2 = vcmask 261120   ;;  %vm996_vm3 = vcmask 1041409  }
  0x79   :  { %v3450_v35 = vld [vmem:[%s4543_s0 + $0xf8] sm:$0xff]   ;;  %v3787_v37 = vld [vmem:[%s4545_s2] ss:$0 sm:$0xff] }
  0x7a   :  { %v892_v12 = vld [vmem:[%s4546_s3 + $0x80] sm:$0xff] }
  0x7b   :  { %v900_v13 = vld [vmem:[%s4546_s3 + $0xc0] sm:$0xff] }
  0x7c   :  { %v2980_v17 = vcombine.high %v892_v12, %v900_v13  ;;  %v2979_v20 = vcombine.low %v892_v12, %v900_v13  ;;  %v876_v26 = vld [vmem:[%s4546_s3] sm:$0xff] }
  0x7d   :  { %v884_v27 = vld [vmem:[%s4546_s3 + $0x40] sm:$0xff] }
  0x7e   :  { %3406 = vmatmul.mubr.msk.bf16.gmra.mxu0 %vm279_vm1, %v3448_v33  ;;  %1174 = vmatprep.subr.bf16.mxu1 %v2980_v17  ;;  %v2964_v31 = vcombine.high %v876_v26, %v884_v27 }
  0x7f   :  { %3409 = vmatprep.mubr.msk.bf16.mxu0 %vm279_vm1, %v3449_v34  ;;  %1175 = vmatpush1.bf16.msra.mxu1 %v2979_v20  ;;  %v2963_v34 = vcombine.low %v876_v26, %v884_v27 }
  0x80   :  { %1176 = vmatprep.subr.bf16.mxu1 %v2964_v31 }
  0x83   :  { %1177 = vmatpush1.bf16.msra.mxu1 %v2963_v34 }
  0x86   :  { %3410 = vmatmul.mubr.msk.bf16.gmra.mxu0 %vm279_vm1, %v3450_v35 }
  0xce   :  { %v3351_v36 = vpop.f32.mrf.mxu0 }
  0xcf   :  { %v423_v41 = vadd.f32 %v3351_v36, %v3787_v37 }
  0xd0   :  { %v414_v38 = vpop.f32.mrf.mxu0 }
  0xd1   :  { %v415_v39 = vadd.f32 %v3787_v37, %v414_v38  ;;  %v671_v47 = vmax.f32 %v423_v41, 0.0  ;;  %v3827_v41 = vld [vmem:[%s4546_s3 + $0x88] sm:$0xff] }
  0xd2   :  { %v3352_v40 = vpop.f32.mrf.mxu0 }
  0xd3   :  { %v669_v43 = vmax.f32 %v415_v39, 0.0  ;;  %v426_v44 = vadd.f32 %v3352_v40, %v3787_v37  ;;  %v737_v56 = vsel %vm733_vm2, %v671_v47, 0.0 }
  0xd4   :  { %v417_v42 = vpop.f32.mrf.mxu0 }
  0xd5   :  { %v418_v45 = vadd.f32 %v3787_v37, %v417_v42  ;;  %v734_v50 = vsel %vm733_vm2, %v669_v43, 0.0  ;;  %v672_v51 = vmax.f32 %v426_v44, 0.0  ;;  %v3832_v42 = vld [vmem:[%s4546_s3 + $0xc8] sm:$0xff] }
  0xd6   :  { %v3355_v46 = vpop.f32.mrf.mxu0 }
  0xd7   :  { %v670_v48 = vmax.f32 %v418_v45, 0.0  ;;  %v439_v57 = vadd.f32 %v3355_v46, %v3787_v37  ;;  %v739_v61 = vsel %vm733_vm2, %v672_v51, 0.0 }
  0xd8   :  { %v430_v49 = vpop.f32.mrf.mxu0 }
  0xd9   :  { %v735_v52 = vsel %vm733_vm2, %v670_v48, 0.0  ;;  %v431_v53 = vadd.f32 %v3787_v37, %v430_v49  ;;  %v675_v2 = vmax.f32 %v439_v57, 0.0  ;;  %v3603_v48 = vmov 0  }
  0xda   :  { %v736_v54 = vadd.f32 %v735_v52, %v734_v50  ;;  %v3356_v55 = vpop.f32.mrf.mxu0  ;;  %1194 = vmatprep.mubr.bf16.mxu1 %v3603_v48  ;;  %v2981_v49 = vcombine.low %v3827_v41, %v3832_v42  ;;  %v2982_v50 = vcombine.high %v3827_v41, %v3832_v42  ;;  %v895_v41 = vld [vmem:[%s4546_s3 + $0x98] sm:$0xff] }
  0xdb   :  { %v673_v58 = vmax.f32 %v431_v53, 0.0  ;;  %v442_v62 = vadd.f32 %v3356_v55, %v3787_v37  ;;  %v745_v14 = vsel %vm733_vm2, %v675_v2, 0.0  ;;  %v903_v42 = vld [vmem:[%s4546_s3 + $0xd8] sm:$0xff] }
  0xdc   :  { %v738_v59 = vadd.f32 %v737_v56, %v736_v54  ;;  %v433_v60 = vpop.f32.mrf.mxu0  ;;  %1215 = vmatprep.subr.bf16.mxu1 %v2982_v50 }
  0xdd   :  { %v434_v63 = vadd.f32 %v3787_v37, %v433_v60  ;;  %v741_v3 = vsel %vm733_vm2, %v673_v58, 0.0  ;;  %v676_v7 = vmax.f32 %v442_v62, 0.0 }
  0xde   :  { %v740_v0 = vadd.f32 %v739_v61, %v738_v59  ;;  %v3359_v1 = vpop.f32.mrf.mxu0 }
  0xdf   :  { %v674_v4 = vmax.f32 %v434_v63, 0.0  ;;  %v455_v15 = vadd.f32 %v3359_v1, %v3787_v37  ;;  %v747_v21 = vsel %vm733_vm2, %v676_v7, 0.0 }
  0xe0   :  { %v742_v5 = vadd.f32 %v741_v3, %v740_v0  ;;  %v446_v6 = vpop.f32.mrf.mxu0 }
  0xe1   :  { %v743_v8 = vsel %vm733_vm2, %v674_v4, 0.0  ;;  %v447_v9 = vadd.f32 %v3787_v37, %v446_v6  ;;  %v679_v28 = vmax.f32 %v455_v15, 0.0 }
  0xe2   :  { %v744_v10 = vadd.f32 %v743_v8, %v742_v5  ;;  %v3360_v11 = vpop.f32.mrf.mxu0 }
  0xe3   :  { %v677_v16 = vmax.f32 %v447_v9, 0.0  ;;  %v458_v22 = vadd.f32 %v3360_v11, %v3787_v37  ;;  %v753_v43 = vsel %vm733_vm2, %v679_v28, 0.0 }
  0xe4   :  { %v746_v18 = vadd.f32 %v745_v14, %v744_v10  ;;  %v449_v19 = vpop.f32.mrf.mxu0 }
  0xe5   :  { %v450_v23 = vadd.f32 %v3787_v37, %v449_v19  ;;  %v749_v29 = vsel %vm733_vm2, %v677_v16, 0.0  ;;  %v680_v35 = vmax.f32 %v458_v22, 0.0 }
  0xe6   :  { %v748_v24 = vadd.f32 %v747_v21, %v746_v18  ;;  %v3363_v25 = vpop.f32.mrf.mxu0 }
  0xe7   :  { %v678_v30 = vmax.f32 %v450_v23, 0.0  ;;  %v471_v44 = vadd.f32 %v3363_v25, %v3787_v37  ;;  %v755_v51 = vsel %vm733_vm2, %v680_v35, 0.0 }
  0xe8   :  { %v750_v32 = vadd.f32 %v749_v29, %v748_v24  ;;  %v462_v33 = vpop.f32.mrf.mxu0 }
  0xe9   :  { %v751_v36 = vsel %vm733_vm2, %v678_v30, 0.0  ;;  %v463_v38 = vadd.f32 %v3787_v37, %v462_v33  ;;  %v683_v56 = vmax.f32 %v471_v44, 0.0 }
  0xea   :  { %v752_v39 = vadd.f32 %v751_v36, %v750_v32  ;;  %v3364_v40 = vpop.f32.mrf.mxu0 }
  0xeb   :  { %v681_v45 = vmax.f32 %v463_v38, 0.0  ;;  %v474_v52 = vadd.f32 %v3364_v40, %v3787_v37  ;;  %v761_v2 = vsel %vm733_vm2, %v683_v56, 0.0 }
  0xec   :  { %v754_v46 = vadd.f32 %v753_v43, %v752_v39  ;;  %v465_v47 = vpop.f32.mrf.mxu0 }
  0xed   :  { %v466_v53 = vadd.f32 %v3787_v37, %v465_v47  ;;  %v757_v57 = vsel %vm733_vm2, %v681_v45, 0.0  ;;  %v684_v61 = vmax.f32 %v474_v52, 0.0 }
  0xee   :  { %v756_v54 = vadd.f32 %v755_v51, %v754_v46  ;;  %v3367_v55 = vpop.f32.mrf.mxu0 }
  0xef   :  { %v682_v58 = vmax.f32 %v466_v53, 0.0  ;;  %v487_v3 = vadd.f32 %v3367_v55, %v3787_v37  ;;  %v763_v7 = vsel %vm733_vm2, %v684_v61, 0.0 }
  0xf0   :  { %v758_v59 = vadd.f32 %v757_v57, %v756_v54  ;;  %v478_v60 = vpop.f32.mrf.mxu0 }
  0xf1   :  { %v759_v62 = vsel %vm733_vm2, %v682_v58, 0.0  ;;  %v479_v63 = vadd.f32 %v3787_v37, %v478_v60  ;;  %v687_v12 = vmax.f32 %v487_v3, 0.0 }
  0xf2   :  { %v760_v0 = vadd.f32 %v759_v62, %v758_v59  ;;  %v3368_v1 = vpop.f32.mrf.mxu0 }
  0xf3   :  { %v685_v4 = vmax.f32 %v479_v63, 0.0  ;;  %v490_v8 = vadd.f32 %v3368_v1, %v3787_v37  ;;  %v769_v22 = vsel %vm733_vm2, %v687_v12, 0.0 }
  0xf4   :  { %v762_v5 = vadd.f32 %v761_v2, %v760_v0  ;;  %v481_v6 = vpop.f32.mrf.mxu0 }
  0xf5   :  { %v482_v9 = vadd.f32 %v3787_v37, %v481_v6  ;;  %v765_v13 = vsel %vm733_vm2, %v685_v4, 0.0  ;;  %v688_v17 = vmax.f32 %v490_v8, 0.0 }
  0xf6   :  { %v764_v10 = vadd.f32 %v763_v7, %v762_v5  ;;  %v3371_v11 = vpop.f32.mrf.mxu0 }
  0xf7   :  { %v686_v14 = vmax.f32 %v482_v9, 0.0  ;;  %v503_v23 = vadd.f32 %v3371_v11, %v3787_v37  ;;  %v771_v27 = vsel %vm733_vm2, %v688_v17, 0.0 }
  0xf8   :  { %v766_v15 = vadd.f32 %v765_v13, %v764_v10  ;;  %v494_v16 = vpop.f32.mrf.mxu0 }
  0xf9   :  { %v767_v18 = vsel %vm733_vm2, %v686_v14, 0.0  ;;  %v495_v19 = vadd.f32 %v3787_v37, %v494_v16  ;;  %v691_v32 = vmax.f32 %v503_v23, 0.0 }
  0xfa   :  { %v768_v20 = vadd.f32 %v767_v18, %v766_v15  ;;  %v3372_v21 = vpop.f32.mrf.mxu0 }
  0xfb   :  { %v689_v24 = vmax.f32 %v495_v19, 0.0  ;;  %v506_v28 = vadd.f32 %v3372_v21, %v3787_v37  ;;  %v777_v45 = vsel %vm733_vm2, %v691_v32, 0.0 }
  0xfc   :  { %v770_v25 = vadd.f32 %v769_v22, %v768_v20  ;;  %v497_v26 = vpop.f32.mrf.mxu0 }
  0xfd   :  { %v498_v29 = vadd.f32 %v3787_v37, %v497_v26  ;;  %v773_v33 = vsel %vm733_vm2, %v689_v24, 0.0  ;;  %v692_v38 = vmax.f32 %v506_v28, 0.0 }
  0xfe   :  { %v772_v30 = vadd.f32 %v771_v27, %v770_v25  ;;  %v3375_v31 = vpop.f32.mrf.mxu0 }
  0xff   :  { %v690_v34 = vmax.f32 %v498_v29, 0.0  ;;  %v519_v46 = vadd.f32 %v3375_v31, %v3787_v37  ;;  %v779_v52 = vsel %vm733_vm2, %v692_v38, 0.0 }
 0x100   :  { %v774_v35 = vadd.f32 %v773_v33, %v772_v30  ;;  %v510_v36 = vpop.f32.mrf.mxu0 }
 0x101   :  { %v775_v39 = vsel %vm733_vm2, %v690_v34, 0.0  ;;  %v511_v40 = vadd.f32 %v3787_v37, %v510_v36  ;;  %v695_v57 = vmax.f32 %v519_v46, 0.0 }
 0x102   :  { %v776_v43 = vadd.f32 %v775_v39, %v774_v35  ;;  %v3376_v44 = vpop.f32.mrf.mxu0 }
 0x103   :  { %v693_v47 = vmax.f32 %v511_v40, 0.0  ;;  %v522_v53 = vadd.f32 %v3376_v44, %v3787_v37  ;;  %v785_v3 = vsel %vm733_vm2, %v695_v57, 0.0 }
 0x104   :  { %v778_v50 = vadd.f32 %v777_v45, %v776_v43  ;;  %v513_v51 = vpop.f32.mrf.mxu0 }
 0x105   :  { %v514_v54 = vadd.f32 %v3787_v37, %v513_v51  ;;  %v781_v58 = vsel %vm733_vm2, %v693_v47, 0.0  ;;  %v696_v62 = vmax.f32 %v522_v53, 0.0 }
 0x106   :  { %v780_v55 = vadd.f32 %v779_v52, %v778_v50  ;;  %v3379_v56 = vpop.f32.mrf.mxu0 }
 0x107   :  { %v694_v59 = vmax.f32 %v514_v54, 0.0  ;;  %v535_v4 = vadd.f32 %v3379_v56, %v3787_v37  ;;  %v787_v8 = vsel %vm733_vm2, %v696_v62, 0.0 }
 0x108   :  { %v782_v60 = vadd.f32 %v781_v58, %v780_v55  ;;  %v526_v61 = vpop.f32.mrf.mxu0 }
 0x109   :  { %v783_v63 = vsel %vm733_vm2, %v694_v59, 0.0  ;;  %v527_v0 = vadd.f32 %v3787_v37, %v526_v61  ;;  %v699_v13 = vmax.f32 %v535_v4, 0.0 }
 0x10a   :  { %v784_v1 = vadd.f32 %v783_v63, %v782_v60  ;;  %v3380_v2 = vpop.f32.mrf.mxu0 }
 0x10b   :  { %v697_v5 = vmax.f32 %v527_v0, 0.0  ;;  %v538_v9 = vadd.f32 %v3380_v2, %v3787_v37  ;;  %v793_v23 = vsel %vm733_vm2, %v699_v13, 0.0  ;;  %v3453_v13 = vld [vmem:[%s4548_s5 + $0x170] sm:$0xff]  }
 0x10c   :  { %v786_v6 = vadd.f32 %v785_v3, %v784_v1  ;;  %v529_v7 = vpop.f32.mrf.mxu0 }
 0x10d   :  { %v530_v10 = vadd.f32 %v3787_v37, %v529_v7  ;;  %v789_v14 = vsel %vm733_vm2, %v697_v5, 0.0  ;;  %v700_v18 = vmax.f32 %v538_v9, 0.0 }
 0x10e   :  { %v788_v11 = vadd.f32 %v787_v8, %v786_v6  ;;  %v3383_v12 = vpop.f32.mrf.mxu0 }
 0x10f   :  { %v698_v15 = vmax.f32 %v530_v10, 0.0  ;;  %v551_v24 = vadd.f32 %v3383_v12, %v3787_v37  ;;  %v795_v27 = vsel %vm733_vm2, %v700_v18, 0.0  ;;  %v3452_v12 = vld [vmem:[%s4548_s5 + $0x138] sm:$0xff]  }
 0x110   :  { %v790_v16 = vadd.f32 %v789_v14, %v788_v11  ;;  %v542_v17 = vpop.f32.mrf.mxu0  ;;  %v3451_v11 = vld [vmem:[%s4548_s5 + $0x178] sm:$0xff]  }
 0x111   :  { %v791_v19 = vsel %vm733_vm2, %v698_v15, 0.0  ;;  %v543_v20 = vadd.f32 %v3787_v37, %v542_v17  ;;  %v703_v33 = vmax.f32 %v551_v24, 0.0  ;;  %3211 = vmatprep.subr.bf16.mxu0 %v3451_v11 }
 0x112   :  { %v792_v21 = vadd.f32 %v791_v19, %v790_v16  ;;  %v3384_v22 = vpop.f32.mrf.mxu0  ;;  %3212 = vmatpush3.bf16.msra.mxu0 %v3452_v12 }
 0x113   :  { %v701_v28 = vmax.f32 %v543_v20, 0.0  ;;  %v554_v29 = vadd.f32 %v3384_v22, %v3787_v37  ;;  %v806_v45 = vsel %vm733_vm2, %v703_v33, 0.0  ;;  %3213 = vmatprep.subr.bf16.mxu0 %v3453_v13 }
 0x114   :  { %v794_v25 = vadd.f32 %v793_v23, %v792_v21  ;;  %v545_v26 = vpop.f32.mrf.mxu0  ;;  %v3454_v21 = vld [vmem:[%s4548_s5 + $0x130] sm:$0xff]  }
 0x115   :  { %v546_v30 = vadd.f32 %v3787_v37, %v545_v26  ;;  %v803_v36 = vsel %vm733_vm2, %v701_v28, 0.0  ;;  %v704_v38 = vmax.f32 %v554_v29, 0.0 }
 0x116   :  { %v3884_v31 = vadd.f32 %v795_v27, %v794_v25  ;;  %v3387_v32 = vpop.f32.mrf.mxu0  ;;  %v3455_v25 = vld [vmem:[%s4548_s5 + $0x168] sm:$0xff]   ;;  %3214 = vmatpush3.bf16.msra.mxu0 %v3454_v21 }
 0x117   :  { %v702_v34 = vmax.f32 %v546_v30, 0.0  ;;  %v567_v46 = vadd.f32 %v3387_v32, %v3787_v37  ;;  %v808_v52 = vsel %vm733_vm2, %v704_v38, 0.0  ;;  %3215 = vmatprep.subr.bf16.mxu0 %v3455_v25 }
 0x118   :  { %v558_v35 = vpop.f32.mrf.mxu0 }
 0x119   :  { %v804_v39 = vsel %vm733_vm2, %v702_v34, 0.0  ;;  %v559_v40 = vadd.f32 %v3787_v37, %v558_v35  ;;  %v707_v57 = vmax.f32 %v567_v46, 0.0  ;;  %v3456_v34 = vld [vmem:[%s4548_s5 + $0x128] sm:$0xff]  }
 0x11a   :  { %v805_v43 = vadd.f32 %v804_v39, %v803_v36  ;;  %v3388_v44 = vpop.f32.mrf.mxu0  ;;  %3216 = vmatpush3.bf16.msra.mxu0 %v3456_v34 }
 0x11b   :  { %v705_v47 = vmax.f32 %v559_v40, 0.0  ;;  %v570_v53 = vadd.f32 %v3388_v44, %v3787_v37  ;;  %v814_v3 = vsel %vm733_vm2, %v707_v57, 0.0 }
 0x11c   :  { %v807_v50 = vadd.f32 %v806_v45, %v805_v43  ;;  %v561_v51 = vpop.f32.mrf.mxu0 }
 0x11d   :  { %v562_v54 = vadd.f32 %v3787_v37, %v561_v51  ;;  %v810_v58 = vsel %vm733_vm2, %v705_v47, 0.0  ;;  %v708_v62 = vmax.f32 %v570_v53, 0.0 }
 0x11e   :  { %v809_v55 = vadd.f32 %v808_v52, %v807_v50  ;;  %v3391_v56 = vpop.f32.mrf.mxu0 }
 0x11f   :  { %v706_v59 = vmax.f32 %v562_v54, 0.0  ;;  %v583_v4 = vadd.f32 %v3391_v56, %v3787_v37  ;;  %v816_v8 = vsel %vm733_vm2, %v708_v62, 0.0  ;;  %v3466_v56 = vld [vmem:[%s4548_s5 + $0x120] sm:$0xff]  }
 0x120   :  { %v811_v60 = vadd.f32 %v810_v58, %v809_v55  ;;  %v574_v61 = vpop.f32.mrf.mxu0  ;;  %v3465_v55 = vld [vmem:[%s4548_s5 + $0x160] sm:$0xff]  }
 0x121   :  { %v812_v63 = vsel %vm733_vm2, %v706_v59, 0.0  ;;  %v575_v0 = vadd.f32 %v3787_v37, %v574_v61  ;;  %v711_v16 = vmax.f32 %v583_v4, 0.0  ;;  %3217 = vmatprep.subr.bf16.mxu0 %v3465_v55 }
 0x122   :  { %v813_v1 = vadd.f32 %v812_v63, %v811_v60  ;;  %v3392_v2 = vpop.f32.mrf.mxu0  ;;  %3218 = vmatpush3.bf16.msra.mxu0 %v3466_v56 }
 0x123   :  { %v709_v5 = vmax.f32 %v575_v0, 0.0  ;;  %v586_v9 = vadd.f32 %v3392_v2, %v3787_v37  ;;  %v822_v28 = vsel %vm733_vm2, %v711_v16, 0.0 }
 0x124   :  { %v815_v6 = vadd.f32 %v814_v3, %v813_v1  ;;  %v577_v7 = vpop.f32.mrf.mxu0 }
 0x125   :  { %v578_v10 = vadd.f32 %v3787_v37, %v577_v7  ;;  %v818_v17 = vsel %vm733_vm2, %v709_v5, 0.0  ;;  %v712_v22 = vmax.f32 %v586_v9, 0.0 }
 0x126   :  { %v817_v14 = vadd.f32 %v816_v8, %v815_v6  ;;  %v3395_v15 = vpop.f32.mrf.mxu0 }
 0x127   :  { %v710_v18 = vmax.f32 %v578_v10, 0.0  ;;  %v599_v29 = vadd.f32 %v3395_v15, %v3787_v37  ;;  %v824_v35 = vsel %vm733_vm2, %v712_v22, 0.0 }
 0x128   :  { %v819_v19 = vadd.f32 %v818_v17, %v817_v14  ;;  %v590_v20 = vpop.f32.mrf.mxu0 }
 0x129   :  { %v820_v23 = vsel %vm733_vm2, %v710_v18, 0.0  ;;  %v591_v24 = vadd.f32 %v3787_v37, %v590_v20  ;;  %v715_v43 = vmax.f32 %v599_v29, 0.0 }
 0x12a   :  { %v821_v26 = vadd.f32 %v820_v23, %v819_v19  ;;  %v3396_v27 = vpop.f32.mrf.mxu0 }
 0x12b   :  { %v713_v30 = vmax.f32 %v591_v24, 0.0  ;;  %v602_v36 = vadd.f32 %v3396_v27, %v3787_v37  ;;  %v830_v57 = vsel %vm733_vm2, %v715_v43, 0.0 }
 0x12c   :  { %v823_v32 = vadd.f32 %v822_v28, %v821_v26  ;;  %v593_v33 = vpop.f32.mrf.mxu0 }
 0x12d   :  { %v594_v38 = vadd.f32 %v3787_v37, %v593_v33  ;;  %v826_v44 = vsel %vm733_vm2, %v713_v30, 0.0  ;;  %v716_v50 = vmax.f32 %v602_v36, 0.0 }
 0x12e   :  { %v825_v39 = vadd.f32 %v824_v35, %v823_v32  ;;  %v3399_v40 = vpop.f32.mrf.mxu0 }
 0x12f   :  { %v714_v45 = vmax.f32 %v594_v38, 0.0  ;;  %v615_v58 = vadd.f32 %v3399_v40, %v3787_v37  ;;  %v832_v62 = vsel %vm733_vm2, %v716_v50, 0.0 }
 0x130   :  { %v827_v46 = vadd.f32 %v826_v44, %v825_v39  ;;  %v606_v47 = vpop.f32.mrf.mxu0 }
 0x131   :  { %v828_v51 = vsel %vm733_vm2, %v714_v45, 0.0  ;;  %v607_v52 = vadd.f32 %v3787_v37, %v606_v47  ;;  %v719_v3 = vmax.f32 %v615_v58, 0.0 }
 0x132   :  { %v829_v53 = vadd.f32 %v828_v51, %v827_v46  ;;  %v3400_v54 = vpop.f32.mrf.mxu0 }
 0x133   :  { %v717_v59 = vmax.f32 %v607_v52, 0.0  ;;  %v618_v63 = vadd.f32 %v3400_v54, %v3787_v37  ;;  %v838_v13 = vsel %vm733_vm2, %v719_v3, 0.0  ;;  %v797_v52 = vrot.slane %v3884_v31, 4 }
 0x134   :  { %v831_v60 = vadd.f32 %v830_v57, %v829_v53  ;;  %v609_v61 = vpop.f32.mrf.mxu0 }
 0x135   :  { %v610_v0 = vadd.f32 %v3787_v37, %v609_v61  ;;  %v834_v4 = vsel %vm733_vm2, %v717_v59, 0.0  ;;  %v720_v8 = vmax.f32 %v618_v63, 0.0  ;;  %v798_v63 = vadd.f32 %v797_v52, %v3884_v31  ;;  %v887_v52 = vld [vmem:[%s4546_s3 + $0x58] sm:$0xff] }
 0x136   :  { %v833_v1 = vadd.f32 %v832_v62, %v831_v60  ;;  %v3403_v2 = vpop.f32.mrf.mxu0 }
 0x137   :  { %v718_v5 = vmax.f32 %v610_v0, 0.0  ;;  %v631_v14 = vadd.f32 %v3403_v2, %v3787_v37  ;;  %v840_v18 = vsel %vm733_vm2, %v720_v8, 0.0 }
 0x138   :  { %v835_v6 = vadd.f32 %v834_v4, %v833_v1  ;;  %v622_v7 = vpop.f32.mrf.mxu0 }
 0x139   :  { %v836_v9 = vsel %vm733_vm2, %v718_v5, 0.0  ;;  %v623_v10 = vadd.f32 %v3787_v37, %v622_v7  ;;  %v723_v23 = vmax.f32 %v631_v14, 0.0 }
 0x13a   :  { %v837_v11 = vadd.f32 %v836_v9, %v835_v6  ;;  %v3404_v12 = vpop.f32.mrf.mxu0  ;;  %v799_v9 = vrot.slane %v798_v63, 2 }
 0x13b   :  { %v721_v15 = vmax.f32 %v623_v10, 0.0  ;;  %v634_v19 = vadd.f32 %v3404_v12, %v3787_v37  ;;  %v846_v34 = vsel %vm733_vm2, %v723_v23, 0.0 }
 0x13c   :  { %v839_v16 = vadd.f32 %v838_v13, %v837_v11  ;;  %v625_v17 = vpop.f32.mrf.mxu0  ;;  %v800_v14 = vadd.f32 %v799_v9, %v798_v63  ;;  %v897_v63 = vld [vmem:[%s4546_s3 + $0xa8] sm:$0xff] }
 0x13d   :  { %v626_v20 = vadd.f32 %v3787_v37, %v625_v17  ;;  %v842_v24 = vsel %vm733_vm2, %v721_v15, 0.0  ;;  %v724_v28 = vmax.f32 %v634_v19, 0.0 }
 0x13e   :  { %v841_v21 = vadd.f32 %v840_v18, %v839_v16  ;;  %v3407_v22 = vpop.f32.mrf.mxu0  ;;  %v801_v18 = vrot.slane %v800_v14, 1 }
 0x13f   :  { %v722_v25 = vmax.f32 %v626_v20, 0.0  ;;  %v647_v35 = vadd.f32 %v3407_v22, %v3787_v37  ;;  %v848_v40 = vsel %vm733_vm2, %v724_v28, 0.0 }
 0x140   :  { %v843_v26 = vadd.f32 %v842_v24, %v841_v21  ;;  %v638_v27 = vpop.f32.mrf.mxu0  ;;  %v802_v20 = vadd.f32 %v801_v18, %v800_v14  ;;  %v899_v14 = vld [vmem:[%s4546_s3 + $0xb8] sm:$0xff] }
 0x141   :  { %v844_v29 = vsel %vm733_vm2, %v722_v25, 0.0  ;;  %v639_v30 = vadd.f32 %v3787_v37, %v638_v27  ;;  %v727_v47 = vmax.f32 %v647_v35, 0.0  ;;  %v883_v18 = vld [vmem:[%s4546_s3 + $0x38] sm:$0xff] }
 0x142   :  { %v845_v32 = vadd.f32 %v844_v29, %v843_v26  ;;  %v3408_v33 = vpop.f32.mrf.mxu0  ;;  %v872_v23 = vmul.f32 0.00390625, %v802_v20 }
 0x143   :  { %v725_v36 = vmax.f32 %v639_v30, 0.0  ;;  %v650_v43 = vadd.f32 %v3408_v33, %v3787_v37  ;;  %v854_v60 = vsel %vm733_vm2, %v727_v47, 0.0  ;;  %v885_v33 = vld [vmem:[%s4546_s3 + $0x48] sm:$0xff] }
 0x144   :  { %v847_v38 = vadd.f32 %v846_v34, %v845_v32  ;;  %v641_v39 = vpop.f32.mrf.mxu0  ;;  %v874_v26 = vpack.c.bf16 %v872_v23, %v872_v23  ;;  %v877_v32 = vld [vmem:[%s4546_s3 + $0x8] sm:$0xff]  ;;  %v3458_v23 = vld [vmem:[%s4548_s5 + $0x38] sm:$0xff]  }
 0x145   :  { %v642_v44 = vadd.f32 %v3787_v37, %v641_v39  ;;  %v850_v50 = vsel %vm733_vm2, %v725_v36, 0.0  ;;  %v728_v55 = vmax.f32 %v650_v43, 0.0  ;;  %v2966_v36 = vcombine.high %v877_v32, %v885_v33  ;;  %v902_v39 = vld [vmem:[%s4546_s3 + $0xd0] sm:$0xff] }
 0x146   :  { %v849_v45 = vadd.f32 %v848_v40, %v847_v38  ;;  %v3411_v46 = vpop.f32.mrf.mxu0  ;;  %v994_v29 = vunpack.c.l.b16 %v874_v26  ;;  %v894_v38 = vld [vmem:[%s4546_s3 + $0x90] sm:$0xff]  ;;  %v2965_v40 = vcombine.low %v877_v32, %v885_v33  ;;  %v3462_v26 = vld [vmem:[%s4548_s5 + $0x28] sm:$0xff]   ;;  %v3475_v33 = vld [vmem:[%s4548_s5 + $0x158] sm:$0xff]  }
 0x147   :  { %v726_v51 = vmax.f32 %v642_v44, 0.0  ;;  %v663_v61 = vadd.f32 %v3411_v46, %v3787_v37  ;;  %v856_v2 = vsel %vm733_vm2, %v728_v55, 0.0  ;;  %v2984_v43 = vcombine.high %v894_v38, %v902_v39  ;;  %v878_v44 = vld [vmem:[%s4546_s3 + $0x10] sm:$0xff]  ;;  %v896_v55 = vld [vmem:[%s4546_s3 + $0xa0] sm:$0xff]  ;;  %3219 = vmatprep.subr.bf16.mxu0 %v3475_v33 }
 0x148   :  { %v851_v53 = vadd.f32 %v850_v50, %v849_v45  ;;  %v654_v54 = vpop.f32.mrf.mxu0  ;;  %v886_v45 = vld [vmem:[%s4546_s3 + $0x50] sm:$0xff]  ;;  %v2983_v46 = vcombine.low %v894_v38, %v902_v39  ;;  %v2986_v50 = vcombine.high %v895_v41, %v903_v42  ;;  %v3472_v39 = vld [vmem:[%s4548_s5 + $0x8] sm:$0xff]  }
 0x149   :  { %v852_v56 = vsel %vm733_vm2, %v726_v51, 0.0  ;;  %v655_v57 = vadd.f32 %v3787_v37, %v654_v54  ;;  %v731_v6 = vmax.f32 %v663_v61, 0.0  ;;  %v2968_v47 = vcombine.high %v878_v44, %v886_v45  ;;  %v879_v51 = vld [vmem:[%s4546_s3 + $0x18] sm:$0xff]  ;;  %v3469_v32 = vld [vmem:[%s4548_s5 + $0x50] sm:$0xff]  }
 0x14a   :  { %v853_v58 = vadd.f32 %v852_v56, %v851_v53  ;;  %v3412_v59 = vpop.f32.mrf.mxu0  ;;  %v2985_v53 = vcombine.low %v895_v41, %v903_v42  ;;  %v2970_v54 = vcombine.high %v879_v51, %v887_v52  ;;  %v904_v56 = vld [vmem:[%s4546_s3 + $0xe0] sm:$0xff]  ;;  %v3480_v38 = vld [vmem:[%s4548_s5 + $0x150] sm:$0xff]  }
 0x14b   :  { %v729_v62 = vmax.f32 %v655_v57, 0.0  ;;  %v666_v3 = vadd.f32 %v3412_v59, %v3787_v37  ;;  %v862_v31 = vsel %vm733_vm2, %v731_v6, 0.0  ;;  %v2969_v57 = vcombine.low %v879_v51, %v887_v52  ;;  %v880_v59 = vld [vmem:[%s4546_s3 + $0x20] sm:$0xff] }
 0x14c   :  { %v855_v0 = vadd.f32 %v854_v60, %v853_v58  ;;  %v657_v1 = vpop.f32.mrf.mxu0  ;;  %v2988_v58 = vcombine.high %v896_v55, %v904_v56  ;;  %v888_v60 = vld [vmem:[%s4546_s3 + $0x60] sm:$0xff]  ;;  %v2987_v61 = vcombine.low %v896_v55, %v904_v56 }
 0x14d   :  { %v658_v4 = vadd.f32 %v3787_v37, %v657_v1  ;;  %v858_v7 = vsel %vm733_vm2, %v729_v62, 0.0  ;;  %v732_v11 = vmax.f32 %v666_v3, 0.0  ;;  %v2972_v62 = vcombine.high %v880_v59, %v888_v60  ;;  %v881_v3 = vld [vmem:[%s4546_s3 + $0x28] sm:$0xff]  ;;  %v3488_v41 = vld [vmem:[%s4548_s5 + $0x140] sm:$0xff]  }
 0x14e   :  { %v857_v5 = vadd.f32 %v856_v2, %v855_v0  ;;  %v905_v0 = vld [vmem:[%s4546_s3 + $0xe8] sm:$0xff]  ;;  %v2971_v1 = vcombine.low %v880_v59, %v888_v60  ;;  %v3490_v42 = vld [vmem:[%s4548_s5 + $0x100] sm:$0xff]  }
 0x14f   :  { %v730_v8 = vmax.f32 %v658_v4, 0.0  ;;  %v864_v16 = vsel %vm733_vm2, %v732_v11, 0.0  ;;  %v2990_v2 = vcombine.high %v897_v63, %v905_v0  ;;  %v889_v4 = vld [vmem:[%s4546_s3 + $0x68] sm:$0xff]  ;;  %v882_v11 = vld [vmem:[%s4546_s3 + $0x30] sm:$0xff]  ;;  %v4185_v60 = vld [vmem:[%s4547_s4] sm:$0xff] }
 0x150   :  { %v859_v10 = vadd.f32 %v858_v7, %v857_v5  ;;  %v2989_v5 = vcombine.low %v897_v63, %v905_v0  ;;  %v2974_v6 = vcombine.high %v881_v3, %v889_v4  ;;  %v898_v7 = vld [vmem:[%s4546_s3 + $0xb0] sm:$0xff]  ;;  %v2973_v9 = vcombine.low %v881_v3, %v889_v4 }
 0x151   :  { %v860_v12 = vsel %vm733_vm2, %v730_v8, 0.0  ;;  %v906_v8 = vld [vmem:[%s4546_s3 + $0xf0] sm:$0xff] }
 0x152   :  { %v861_v13 = vadd.f32 %v860_v12, %v859_v10  ;;  %v2992_v10 = vcombine.high %v898_v7, %v906_v8  ;;  %v890_v12 = vld [vmem:[%s4546_s3 + $0x70] sm:$0xff] }
 0x154   :  { %v863_v15 = vadd.f32 %v862_v31, %v861_v13  ;;  %v2991_v13 = vcombine.low %v898_v7, %v906_v8  ;;  %v2976_v31 = vcombine.high %v882_v11, %v890_v12 }
 0x156   :  { %v865_v17 = vadd.f32 %v864_v16, %v863_v15  ;;  %v907_v15 = vld [vmem:[%s4546_s3 + $0xf8] sm:$0xff]  ;;  %v2975_v16 = vcombine.low %v882_v11, %v890_v12 }
 0x157   :  { %v3478_v11 = vld [vmem:[%s4548_s5 + $0xb8] sm:$0xff]  }
 0x158   :  { %v866_v37 = vrot.slane %v865_v17, 4 }
 0x15a   :  { %v867_v19 = vadd.f32 %v866_v37, %v865_v17  ;;  %v2994_v17 = vcombine.high %v899_v14, %v907_v15  ;;  %v891_v37 = vld [vmem:[%s4546_s3 + $0x78] sm:$0xff] }
 0x15b   :  { %v2978_v20 = vcombine.high %v883_v18, %v891_v37 }
 0x15c   :  { %v868_v21 = vrot.slane %v867_v19, 2 }
 0x15e   :  { %v869_v22 = vadd.f32 %v868_v21, %v867_v19  ;;  %v2993_v19 = vcombine.low %v899_v14, %v907_v15  ;;  %v2977_v21 = vcombine.low %v883_v18, %v891_v37 }
 0x160   :  { %v870_v24 = vrot.slane %v869_v22, 1 }
 0x162   :  { %v871_v25 = vadd.f32 %v870_v24, %v869_v22  ;;  %v3457_v22 = vld [vmem:[%s4548_s5 + $0x78] sm:$0xff]   ;;  %v3459_v24 = vld [vmem:[%s4548_s5 + $0x70] sm:$0xff]  }
 0x164   :  { %v873_v27 = vmul.f32 0.00390625, %v871_v25  ;;  %v3461_v25 = vld [vmem:[%s4548_s5 + $0x68] sm:$0xff]  }
 0x166   :  { %v875_v28 = vpack.c.bf16 %v873_v27, %v873_v27  ;;  %v3463_v27 = vld [vmem:[%s4548_s5 + $0x60] sm:$0xff]  }
 0x168   :  { %v995_v30 = vunpack.c.l.b16 %v875_v28  ;;  %v3464_v28 = vld [vmem:[%s4548_s5 + $0x20] sm:$0xff]  }
 0x16a   :  { %v997_v34 = vsel %vm996_vm3, %v995_v30, %v994_v29  ;;  %v3467_v29 = vld [vmem:[%s4548_s5 + $0x58] sm:$0xff]  }
 0x16b   :  { %v3978_v35 = vpack.c.b16 %v997_v34, %v997_v34  ;;  %v3468_v30 = vld [vmem:[%s4548_s5 + $0x18] sm:$0xff]  }
 0x16c   :  { %v3476_v34 = vld [vmem:[%s4548_s5 + $0x118] sm:$0xff]  }
 0x16d   :  { %2995 = vmatmul.mubr.msk.bf16.vlgmr.msra.gmra.mxu1 %vm733_vm2, %v3978_v35  ;;  %3220 = vmatpush3.bf16.msra.mxu0 %v3476_v34  ;;  %v3491_v34 = vld [vmem:[%s4548_s5 + $0xd8] sm:$0xff]  }
 0x16e   :  { %1216 = vmatpush1.bf16.msra.mxu1 %v2981_v49  ;;  %1235 = vmatprep.mubr.bf16.mxu1 %v3603_v48  ;;  %v2967_v49 = vcombine.low %v878_v44, %v886_v45  ;;  %v3484_v44 = vld [vmem:[%s4548_s5 + $0x148] sm:$0xff]   ;;  %v3474_v45 = vld [vmem:[%s4548_s5] sm:$0xff]  }
 0x16f   :  { %1217 = vmatprep.subr.bf16.mxu1 %v2966_v36  ;;  %v3471_v36 = vld [vmem:[%s4548_s5 + $0x48] sm:$0xff]   ;;  %3221 = vmatprep.subr.bf16.mxu0 %v3480_v38 }
 0x172   :  { %1218 = vmatpush1.bf16.msra.mxu1 %v2965_v40  ;;  %v3482_v40 = vld [vmem:[%s4548_s5 + $0x110] sm:$0xff]  }
 0x173   :  { %1256 = vmatprep.subr.bf16.mxu1 %v2984_v43  ;;  %v3473_v43 = vld [vmem:[%s4548_s5 + $0x40] sm:$0xff]   ;;  %3222 = vmatpush3.bf16.msra.mxu0 %v3482_v40  ;;  %v3494_v40 = vld [vmem:[%s4548_s5 + $0x238] sm:$0xff]  }
 0x174   :  { %3223 = vmatprep.subr.bf16.mxu0 %v3484_v44 }
 0x175   :  { %2996 = vmatmul.mubr.msk.bf16.vlgmr.msra.gmra.mxu1 %vm733_vm2, %v3978_v35 }
 0x176   :  { %1257 = vmatpush1.bf16.msra.mxu1 %v2983_v46  ;;  %1276 = vmatprep.mubr.bf16.mxu1 %v3603_v48  ;;  %v3486_v46 = vld [vmem:[%s4548_s5 + $0x108] sm:$0xff]  }
 0x177   :  { %1258 = vmatprep.subr.bf16.mxu1 %v2968_v47  ;;  %v3477_v47 = vld [vmem:[%s4548_s5 + $0xf8] sm:$0xff]   ;;  %3224 = vmatpush3.bf16.msra.mxu0 %v3486_v46  ;;  %v3496_v46 = vld [vmem:[%s4548_s5 + $0x270] sm:$0xff]  }
 0x178   :  { %3225 = vmatprep.subr.bf16.mxu0 %v3488_v41  ;;  %v3497_v41 = vld [vmem:[%s4548_s5 + $0x90] sm:$0xff]  }
 0x17a   :  { %1259 = vmatpush1.bf16.msra.mxu1 %v2967_v49  ;;  %v3492_v49 = vld [vmem:[%s4548_s5 + $0x278] sm:$0xff]  }
 0x17b   :  { %1297 = vmatprep.subr.bf16.mxu1 %v2986_v50  ;;  %3226 = vmatpush3.bf16.msra.mxu0 %v3490_v42  ;;  %v912_v50 = vlaneseq  ;;  %v3498_v42 = vld [vmem:[%s4548_s5 + $0x230] sm:$0xff]  }
 0x17c   :  { %3255 = vmatprep.subr.bf16.mxu0 %v3492_v49 }
 0x17d   :  { %2997 = vmatmul.mubr.msk.bf16.vlgmr.msra.gmra.mxu1 %vm733_vm2, %v3978_v35  ;;  %v4156_v51 = vshrl.u32 %v912_v50, 7 }
 0x17e   :  { %1298 = vmatpush1.bf16.msra.mxu1 %v2985_v53  ;;  %1317 = vmatprep.mubr.bf16.mxu1 %v3603_v48  ;;  %v4162_v53 = vld [vmem:[%s4547_s4 + $0x8] sm:$0xff] }
 0x17f   :  { %1299 = vmatprep.subr.bf16.mxu1 %v2970_v54  ;;  %v922_v52 = vsub.s32 2, %v4156_v51  ;;  %v938_v55 = vsub.s32 6, %v4156_v51  ;;  %v914_v59 = vsub.s32 0, %v4156_v51  ;;  %v926_v4 = vsub.s32 3, %v4156_v51 }
 0x180   :  { %v930_v14 = vsub.s32 4, %v4156_v51  ;;  %v934_v18 = vsub.s32 5, %v4156_v51 }
 0x181   :  { %v4167_v54 = vrot.slane %v4162_v53, %v922_v52  ;;  %v4173_v56 = vrot.slane %v4162_v53, %v938_v55  ;;  %v923_v49 = vrot.slane %v4185_v60, %v922_v52 }
 0x182   :  { %1300 = vmatpush1.bf16.msra.mxu1 %v2969_v57  ;;  %v942_v57 = vsub.s32 7, %v4156_v51 }
 0x183   :  { %1338 = vmatprep.subr.bf16.mxu1 %v2988_v58 }
 0x184   :  { %v4179_v58 = vrot.slane %v4162_v53, %v942_v57 }
 0x185   :  { %2998 = vmatmul.mubr.msk.bf16.vlgmr.msra.gmra.mxu1 %vm733_vm2, %v3978_v35 }
 0x186   :  { %1339 = vmatpush1.bf16.msra.mxu1 %v2987_v61  ;;  %1358 = vmatprep.mubr.bf16.mxu1 %v3603_v48  ;;  %v918_v61 = vsub.s32 1, %v4156_v51  ;;  %v3551_v51 = vld [vmem:[%s4548_s5 + $0x2e0] sm:$0xff]  }
 0x187   :  { %1340 = vmatprep.subr.bf16.mxu1 %v2972_v62  ;;  %v915_v62 = vrot.slane %v4185_v60, %v914_v59 }
 0x188   :  { %v919_v63 = vrot.slane %v4185_v60, %v918_v61  ;;  %v951_v52 = vrot.slane %v4162_v53, %v918_v61  ;;  %v3504_v61 = vld [vmem:[%s4548_s5 + $0x260] sm:$0xff]  }
 0x18a   :  { %1341 = vmatpush1.bf16.msra.mxu1 %v2971_v1 }
 0x18b   :  { %1379 = vmatprep.subr.bf16.mxu1 %v2990_v2 }
 0x18d   :  { %2999 = vmatmul.mubr.msk.bf16.vlgmr.msra.gmra.mxu1 %vm733_vm2, %v3978_v35 }
 0x18e   :  { %1380 = vmatpush1.bf16.msra.mxu1 %v2989_v5  ;;  %1399 = vmatprep.mubr.bf16.mxu1 %v3603_v48 }
 0x18f   :  { %1381 = vmatprep.subr.bf16.mxu1 %v2974_v6 }
 0x192   :  { %1382 = vmatpush1.bf16.msra.mxu1 %v2973_v9 }
 0x193   :  { %1420 = vmatprep.subr.bf16.mxu1 %v2992_v10  ;;  %v927_v10 = vrot.slane %v4185_v60, %v926_v4 }
 0x195   :  { %3000 = vmatmul.mubr.msk.bf16.vlgmr.msra.gmra.mxu1 %vm733_vm2, %v3978_v35 }
 0x196   :  { %1421 = vmatpush1.bf16.msra.mxu1 %v2991_v13  ;;  %1440 = vmatprep.mubr.bf16.mxu1 %v3603_v48 }
 0x197   :  { %1422 = vmatprep.subr.bf16.mxu1 %v2976_v31  ;;  %v3479_v31 = vld [vmem:[%s4548_s5 + $0xf0] sm:$0xff]  }
 0x19a   :  { %1423 = vmatpush1.bf16.msra.mxu1 %v2975_v16 }
 0x19b   :  { %1461 = vmatprep.subr.bf16.mxu1 %v2994_v17  ;;  %v3481_v17 = vld [vmem:[%s4548_s5 + $0xb0] sm:$0xff]  }
 0x19d   :  { %3001 = vmatmul.mubr.msk.bf16.vlgmr.msra.gmra.mxu1 %vm733_vm2, %v3978_v35 }
 0x19e   :  { %1462 = vmatpush1.bf16.msra.mxu1 %v2993_v19  ;;  %1481 = vmatprep.mubr.bf16.mxu1 %v3603_v48  ;;  %v3460_v48 = vld [vmem:[%s4548_s5 + $0x30] sm:$0xff]   ;;  %v3483_v19 = vld [vmem:[%s4548_s5 + $0xe8] sm:$0xff]  }
 0x19f   :  { %1463 = vmatprep.subr.bf16.mxu1 %v2978_v20 }
 0x1a2   :  { %1464 = vmatpush1.bf16.msra.mxu1 %v2977_v21  ;;  %v931_v21 = vrot.slane %v4185_v60, %v930_v14 }
 0x1a3   :  { %3167 = vmatprep.subr.bf16.mxu1 %v3457_v22 }
 0x1a5   :  { %3002 = vmatmul.mubr.msk.bf16.vlgmr.msra.gmra.mxu1 %vm733_vm2, %v3978_v35  ;;  %v3470_v35 = vld [vmem:[%s4548_s5 + $0x10] sm:$0xff]  }
 0x1a6   :  { %3168 = vmatpush3.bf16.msra.mxu1 %v3458_v23 }
 0x1a7   :  { %3169 = vmatprep.subr.bf16.mxu1 %v3459_v24  ;;  %v935_v24 = vrot.slane %v4185_v60, %v934_v18 }
 0x1aa   :  { %3170 = vmatpush3.bf16.msra.mxu1 %v3460_v48  ;;  %v3485_v48 = vld [vmem:[%s4548_s5 + $0xa8] sm:$0xff]  }
 0x1ab   :  { %3171 = vmatprep.subr.bf16.mxu1 %v3461_v25 }
 0x1ae   :  { %3172 = vmatpush3.bf16.msra.mxu1 %v3462_v26  ;;  %v3487_v26 = vld [vmem:[%s4548_s5 + $0xe0] sm:$0xff]  }
 0x1af   :  { %3173 = vmatprep.subr.bf16.mxu1 %v3463_v27 }
 0x1b2   :  { %3174 = vmatpush3.bf16.msra.mxu1 %v3464_v28 }
 0x1b3   :  { %3175 = vmatprep.subr.bf16.mxu1 %v3467_v29 }
 0x1b6   :  { %3176 = vmatpush3.bf16.msra.mxu1 %v3468_v30  ;;  %v3489_v30 = vld [vmem:[%s4548_s5 + $0xa0] sm:$0xff]  }
 0x1b7   :  { %3177 = vmatprep.subr.bf16.mxu1 %v3469_v32 }
 0x1ba   :  { %3178 = vmatpush3.bf16.msra.mxu1 %v3470_v35 }
 0x1bb   :  { %3179 = vmatprep.subr.bf16.mxu1 %v3471_v36 }
 0x1be   :  { %3180 = vmatpush3.bf16.msra.mxu1 %v3472_v39  ;;  %v3493_v39 = vld [vmem:[%s4548_s5 + $0x98] sm:$0xff]  }
 0x1bf   :  { %3181 = vmatprep.subr.bf16.mxu1 %v3473_v43 }
 0x1c2   :  { %3182 = vmatpush3.bf16.msra.mxu1 %v3474_v45  ;;  %v3495_v45 = vld [vmem:[%s4548_s5 + $0xd0] sm:$0xff]  }
 0x1c3   :  { %3189 = vmatprep.subr.bf16.mxu1 %v3477_v47 }
 0x22d   :  { %v1196_v0 = vpop.f32.mrf.mxu1 }
 0x22e   :  { %v1197_v1 = vadd.f32 %v1196_v0, %v915_v62  ;;  %v3499_v62 = vld [vmem:[%s4548_s5 + $0xc8] sm:$0xff]   ;;  %v943_v0 = vrot.slane %v4185_v60, %v942_v57  ;;  %v3503_v57 = vld [vmem:[%s4548_s5 + $0xc0] sm:$0xff]  }
 0x22f   :  { %v1198_v2 = vpop.f32.mrf.mxu1 }
 0x230   :  { %v1199_v3 = vadd.f32 %v1198_v2, %v919_v63  ;;  %v1490_v5 = vmax.f32 %v1197_v1, 0.0  ;;  %v3500_v63 = vld [vmem:[%s4548_s5 + $0x268] sm:$0xff]  }
 0x231   :  { %v1200_v6 = vpop.f32.mrf.mxu1  ;;  %v3501_v2 = vld [vmem:[%s4548_s5 + $0x88] sm:$0xff]  }
 0x232   :  { %v1491_v7 = vmax.f32 %v1199_v3, 0.0  ;;  %v1506_v12 = vpack.c.bf16 %v1490_v5, %v1490_v5  ;;  %v3502_v3 = vld [vmem:[%s4548_s5 + $0x228] sm:$0xff]  }
 0x233   :  { %v1201_v8 = vpop.f32.mrf.mxu1 }
 0x234   :  { %v1507_v9 = vpack.c.bf16 %v1491_v7, %v1491_v7 }
 0x235   :  { %v4201_v13 = vpop.f32.mrf.mxu1 }
 0x236   :  { %2585 = vmatprep.mubr.bf16.mxu1 %v1507_v9  ;;  %v1238_v5 = vadd.f32 %v4201_v13, %v923_v49 }
 0x237   :  { %v1239_v15 = vpop.f32.mrf.mxu1  ;;  %2586 = vmatmul.mubr.bf16.vlgmr.msra.gmra.mxu1 %v1506_v12 }
 0x238   :  { %v1240_v16 = vadd.f32 %v1239_v15, %v927_v10  ;;  %3190 = vmatpush3.bf16.msra.mxu1 %v3478_v11  ;;  %v3505_v10 = vld [vmem:[%s4548_s5 + $0x80] sm:$0xff]   ;;  %v1492_v12 = vmax.f32 %v1238_v5, 0.0  ;;  %v3508_v15 = vld [vmem:[%s4548_s5 + $0x258] sm:$0xff]  }
 0x239   :  { %v1241_v37 = vpop.f32.mrf.mxu1  ;;  %3191 = vmatprep.subr.bf16.mxu1 %v3479_v31  ;;  %v3506_v11 = vld [vmem:[%s4548_s5 + $0x220] sm:$0xff]   ;;  %v3507_v31 = vld [vmem:[%s4548_s5 + $0x1f8] sm:$0xff]  }
 0x23a   :  { %v1493_v20 = vmax.f32 %v1240_v16, 0.0 }
 0x23b   :  { %v1242_v22 = vpop.f32.mrf.mxu1 }
 0x23c   :  { %v1509_v23 = vpack.c.bf16 %v1493_v20, %v1493_v20  ;;  %3192 = vmatpush3.bf16.msra.mxu1 %v3481_v17  ;;  %v3509_v20 = vld [vmem:[%s4548_s5 + $0x1b8] sm:$0xff]  }
 0x23d   :  { %v1278_v25 = vpop.f32.mrf.mxu1  ;;  %3193 = vmatprep.subr.bf16.mxu1 %v3483_v19 }
 0x23e   :  { %v1279_v27 = vadd.f32 %v1278_v25, %v931_v21  ;;  %2625 = vmatprep.mubr.bf16.mxu1 %v1509_v23  ;;  %v1508_v21 = vpack.c.bf16 %v1492_v12, %v1492_v12  ;;  %v3510_v23 = vld [vmem:[%s4548_s5 + $0x218] sm:$0xff]   ;;  %v3512_v25 = vld [vmem:[%s4548_s5 + $0x250] sm:$0xff]   ;;  %v3533_v12 = vld [vmem:[%s4548_s5 + $0x188] sm:$0xff]  }
 0x23f   :  { %v1280_v28 = vpop.f32.mrf.mxu1 }
 0x240   :  { %v1281_v29 = vadd.f32 %v1280_v28, %v935_v24  ;;  %3194 = vmatpush3.bf16.msra.mxu1 %v3485_v48  ;;  %v1494_v32 = vmax.f32 %v1279_v27, 0.0  ;;  %v3511_v24 = vld [vmem:[%s4548_s5 + $0x1f0] sm:$0xff]  }
 0x241   :  { %v1282_v33 = vpop.f32.mrf.mxu1  ;;  %3195 = vmatprep.subr.bf16.mxu1 %v3487_v26  ;;  %v3513_v27 = vld [vmem:[%s4548_s5 + $0x1b0] sm:$0xff]  }
 0x242   :  { %v1495_v35 = vmax.f32 %v1281_v29, 0.0  ;;  %v1510_v43 = vpack.c.bf16 %v1494_v32, %v1494_v32  ;;  %v3514_v29 = vld [vmem:[%s4548_s5 + $0x210] sm:$0xff]   ;;  %v947_v32 = vrot.slane %v4162_v53, %v914_v59  ;;  %v3516_v33 = vld [vmem:[%s4548_s5 + $0x248] sm:$0xff]  }
 0x243   :  { %v1283_v36 = vpop.f32.mrf.mxu1  ;;  %v3518_v59 = vld [vmem:[%s4548_s5 + $0x208] sm:$0xff]  }
 0x244   :  { %v1511_v38 = vpack.c.bf16 %v1495_v35, %v1495_v35  ;;  %3196 = vmatpush3.bf16.msra.mxu1 %v3489_v30  ;;  %v3515_v30 = vld [vmem:[%s4548_s5 + $0x1e8] sm:$0xff]   ;;  %v967_v35 = vrot.slane %v4162_v53, %v934_v18  ;;  %v3520_v18 = vld [vmem:[%s4548_s5 + $0x240] sm:$0xff]  }
 0x245   :  { %v4238_v44 = vpop.f32.mrf.mxu1  ;;  %3197 = vmatprep.subr.bf16.mxu1 %v3491_v34  ;;  %v3517_v36 = vld [vmem:[%s4548_s5 + $0x1a8] sm:$0xff]  }
 0x246   :  { %2665 = vmatprep.mubr.bf16.mxu0 %v1511_v38 }
 0x247   :  { %v1321_v47 = vpop.f32.mrf.mxu1  ;;  %2666 = vmatmul.mubr.bf16.vlgmr.msra.gmra.mxu0 %v1510_v43 }
 0x248   :  { %3198 = vmatpush3.bf16.msra.mxu1 %v3493_v39  ;;  %3256 = vmatpush3.bf16.msra.mxu0 %v3494_v40  ;;  %v1322_v7 = vadd.f32 %v1321_v47, %v943_v0  ;;  %v3519_v39 = vld [vmem:[%s4548_s5 + $0x1e0] sm:$0xff]   ;;  %v3525_v0 = vld [vmem:[%s4548_s5 + $0x198] sm:$0xff]  }
 0x249   :  { %v1323_v50 = vpop.f32.mrf.mxu1  ;;  %3199 = vmatprep.subr.bf16.mxu1 %v3495_v45  ;;  %3257 = vmatprep.subr.bf16.mxu0 %v3496_v46  ;;  %v3521_v46 = vld [vmem:[%s4548_s5 + $0x1a0] sm:$0xff]  }
 0x24a   :  { %v1497_v16 = vmax.f32 %v1322_v7, 0.0  ;;  %v3529_v7 = vld [vmem:[%s4548_s5 + $0x190] sm:$0xff]  }
 0x24b   :  { %v1324_v1 = vpop.f32.mrf.mxu1 }
 0x24c   :  { %3200 = vmatpush3.bf16.msra.mxu1 %v3497_v41  ;;  %3258 = vmatpush3.bf16.msra.mxu0 %v3498_v42  ;;  %v1513_v48 = vpack.c.bf16 %v1497_v16, %v1497_v16  ;;  %v3522_v41 = vld [vmem:[%s4548_s5 + $0x200] sm:$0xff]   ;;  %v3523_v42 = vld [vmem:[%s4548_s5 + $0x1d8] sm:$0xff]  }
 0x24d   :  { %v1360_v6 = vpop.f32.mrf.mxu1  ;;  %3201 = vmatprep.subr.bf16.mxu1 %v3499_v62  ;;  %3259 = vmatprep.subr.bf16.mxu0 %v3500_v63  ;;  %v3524_v62 = vld [vmem:[%s4548_s5 + $0x378] sm:$0xff]   ;;  %v3536_v16 = vld [vmem:[%s4548_s5 + $0x360] sm:$0xff]  }
 0x24e   :  { %v1361_v40 = vadd.f32 %v1360_v6, %v947_v32  ;;  %v3527_v6 = vld [vmem:[%s4548_s5 + $0x1d0] sm:$0xff]   ;;  %v963_v32 = vrot.slane %v4162_v53, %v930_v14  ;;  %v3552_v14 = vld [vmem:[%s4548_s5 + $0x340] sm:$0xff]  }
 0x24f   :  { %v1362_v8 = vpop.f32.mrf.mxu1 }
 0x250   :  { %v1363_v9 = vadd.f32 %v1362_v8, %v951_v52  ;;  %3202 = vmatpush3.bf16.msra.mxu1 %v3501_v2  ;;  %3260 = vmatpush3.bf16.msra.mxu0 %v3502_v3  ;;  %v1498_v49 = vmax.f32 %v1361_v40, 0.0  ;;  %v3526_v2 = vld [vmem:[%s4548_s5 + $0x338] sm:$0xff]  }
 0x251   :  { %v1364_v13 = vpop.f32.mrf.mxu1  ;;  %3203 = vmatprep.subr.bf16.mxu1 %v3503_v57  ;;  %3261 = vmatprep.subr.bf16.mxu0 %v3504_v61  ;;  %v3528_v57 = vld [vmem:[%s4548_s5 + $0x370] sm:$0xff]   ;;  %v3556_v40 = vld [vmem:[%s4548_s5 + $0x298] sm:$0xff]  }
 0x252   :  { %v1499_v17 = vmax.f32 %v1363_v9, 0.0  ;;  %v1514_v3 = vpack.c.bf16 %v1498_v49, %v1498_v49  ;;  %v3530_v9 = vld [vmem:[%s4548_s5 + $0x330] sm:$0xff]  }
 0x253   :  { %v1365_v37 = vpop.f32.mrf.mxu1 }
 0x254   :  { %v1515_v19 = vpack.c.bf16 %v1499_v17, %v1499_v17  ;;  %3204 = vmatpush3.bf16.msra.mxu1 %v3505_v10  ;;  %3262 = vmatpush3.bf16.msra.mxu0 %v3506_v11  ;;  %v3531_v10 = vld [vmem:[%s4548_s5 + $0x1c8] sm:$0xff]   ;;  %v959_v11 = vrot.slane %v4162_v53, %v926_v4  ;;  %v3538_v37 = vld [vmem:[%s4548_s5 + $0x320] sm:$0xff]  }
 0x255   :  { %v4295_v22 = vpop.f32.mrf.mxu1  ;;  %3233 = vmatprep.subr.bf16.mxu1 %v3507_v31  ;;  %3263 = vmatprep.subr.bf16.mxu0 %v3508_v15  ;;  %v3534_v4 = vld [vmem:[%s4548_s5 + $0x328] sm:$0xff]   ;;  %v3535_v31 = vld [vmem:[%s4548_s5 + $0x1c0] sm:$0xff]  }
 0x256   :  { %2745 = vmatprep.mubr.bf16.mxu0 %v1515_v19  ;;  %v3539_v19 = vld [vmem:[%s4548_s5 + $0x2f8] sm:$0xff]  }
 0x257   :  { %2626 = vmatmul.mubr.bf16.vlgmr.msra.gmra.mxu1 %v1508_v21  ;;  %v4306_v26 = vpop.f32.mrf.mxu1  ;;  %v3540_v21 = vld [vmem:[%s4548_s5 + $0x358] sm:$0xff]  }
 0x258   :  { %3234 = vmatpush3.bf16.msra.mxu1 %v3509_v20  ;;  %2705 = vmatprep.mubr.bf16.mxu1 %v1513_v48  ;;  %v1404_v15 = vadd.f32 %v4306_v26, %v959_v11  ;;  %v3542_v48 = vld [vmem:[%s4548_s5 + $0x318] sm:$0xff]   ;;  %v3577_v11 = vld [vmem:[%s4548_s5 + $0x3c0] sm:$0xff]  }
 0x259   :  { %3264 = vmatpush3.bf16.msra.mxu0 %v3510_v23  ;;  %v1405_v28 = vpop.f32.mrf.mxu1  ;;  %3235 = vmatprep.subr.bf16.mxu1 %v3511_v24  ;;  %v3541_v23 = vld [vmem:[%s4548_s5 + $0x2b8] sm:$0xff]  }
 0x25a   :  { %3265 = vmatprep.subr.bf16.mxu0 %v3512_v25  ;;  %v1501_v20 = vmax.f32 %v1404_v15, 0.0  ;;  %v3543_v25 = vld [vmem:[%s4548_s5 + $0x2f0] sm:$0xff]  }
 0x25b   :  { %v1406_v34 = vpop.f32.mrf.mxu1  ;;  %v3545_v28 = vld [vmem:[%s4548_s5 + $0x2b0] sm:$0xff]  }
 0x25c   :  { %3236 = vmatpush3.bf16.msra.mxu1 %v3513_v27  ;;  %v1517_v26 = vpack.c.bf16 %v1501_v20, %v1501_v20  ;;  %v3544_v27 = vld [vmem:[%s4548_s5 + $0x350] sm:$0xff]   ;;  %v3549_v34 = vld [vmem:[%s4548_s5 + $0x2a8] sm:$0xff]  }
 0x25d   :  { %3266 = vmatpush3.bf16.msra.mxu0 %v3514_v29  ;;  %v4329_v38 = vpop.f32.mrf.mxu1  ;;  %3237 = vmatprep.subr.bf16.mxu1 %v3515_v30  ;;  %v3546_v29 = vld [vmem:[%s4548_s5 + $0x310] sm:$0xff]   ;;  %v3547_v30 = vld [vmem:[%s4548_s5 + $0x2e8] sm:$0xff]  }
 0x25e   :  { %3267 = vmatprep.subr.bf16.mxu0 %v3516_v33  ;;  %v3548_v33 = vld [vmem:[%s4548_s5 + $0x348] sm:$0xff]   ;;  %v1443_v53 = vadd.f32 %v4329_v38, %v963_v32  ;;  %v3555_v38 = vld [vmem:[%s4548_s5 + $0x2d8] sm:$0xff]  }
 0x25f   :  { %v1444_v43 = vpop.f32.mrf.mxu1 }
 0x260   :  { %v1445_v45 = vadd.f32 %v1444_v43, %v967_v35  ;;  %3238 = vmatpush3.bf16.msra.mxu1 %v3517_v36  ;;  %v3550_v35 = vld [vmem:[%s4548_s5 + $0x308] sm:$0xff]   ;;  %v3553_v36 = vld [vmem:[%s4548_s5 + $0x2a0] sm:$0xff]  }
 0x261   :  { %3268 = vmatpush3.bf16.msra.mxu0 %v3518_v59  ;;  %v1446_v47 = vpop.f32.mrf.mxu1  ;;  %3239 = vmatprep.subr.bf16.mxu1 %v3519_v39  ;;  %v3554_v59 = vld [vmem:[%s4548_s5 + $0x300] sm:$0xff]   ;;  %v1502_v39 = vmax.f32 %v1443_v53, 0.0 }
 0x262   :  { %v1503_v50 = vmax.f32 %v1445_v45, 0.0  ;;  %3269 = vmatprep.subr.bf16.mxu0 %v3520_v18  ;;  %v3557_v18 = vld [vmem:[%s4548_s5 + $0x2d0] sm:$0xff]   ;;  %v3560_v47 = vld [vmem:[%s4548_s5 + $0x288] sm:$0xff]  }
 0x263   :  { %v1447_v63 = vpop.f32.mrf.mxu1  ;;  %v1518_v43 = vpack.c.bf16 %v1502_v39, %v1502_v39  ;;  %v3558_v45 = vld [vmem:[%s4548_s5 + $0x290] sm:$0xff]  }
 0x264   :  { %3240 = vmatpush3.bf16.msra.mxu1 %v3521_v46  ;;  %v1519_v1 = vpack.c.bf16 %v1503_v50, %v1503_v50  ;;  %v3559_v46 = vld [vmem:[%s4548_s5 + $0x2c8] sm:$0xff]   ;;  %v3562_v50 = vld [vmem:[%s4548_s5 + $0x280] sm:$0xff]   ;;  %v3563_v63 = vld [vmem:[%s4548_s5 + $0x3f8] sm:$0xff]  }
 0x265   :  { %3270 = vmatpush3.bf16.msra.mxu0 %v3522_v41  ;;  %v1483_v52 = vpop.f32.mrf.mxu1  ;;  %3241 = vmatprep.subr.bf16.mxu1 %v3523_v42  ;;  %v1402_v41 = vadd.f32 %v4295_v22, %v4167_v54  ;;  %v3561_v42 = vld [vmem:[%s4548_s5 + $0x2c0] sm:$0xff]   ;;  %v3564_v22 = vld [vmem:[%s4548_s5 + $0x3b8] sm:$0xff]  }
 0x266   :  { %v4359_v5 = vadd.f32 %v1483_v52, %v4173_v56  ;;  %3299 = vmatprep.subr.bf16.mxu0 %v3524_v62  ;;  %v939_v56 = vrot.slane %v4185_v60, %v938_v55  ;;  %v3532_v55 = vld [vmem:[%s4548_s5 + $0x368] sm:$0xff]   ;;  %v3566_v52 = vld [vmem:[%s4548_s5 + $0x3b0] sm:$0xff]  }
 0x267   :  { %v4367_v61 = vpop.f32.mrf.mxu1  ;;  %v1500_v62 = vmax.f32 %v1402_v41, 0.0 }
 0x268   :  { %2746 = vmatmul.mubr.bf16.vlgmr.msra.gmra.mxu0 %v1514_v3  ;;  %3242 = vmatpush3.bf16.msra.mxu1 %v3525_v0  ;;  %v1320_v13 = vadd.f32 %v4238_v44, %v939_v56  ;;  %v3537_v44 = vld [vmem:[%s4548_s5 + $0x180] sm:$0xff]   ;;  %v1486_v49 = vadd.f32 %v4367_v61, %v4179_v58  ;;  %v3565_v58 = vld [vmem:[%s4548_s5 + $0x3f0] sm:$0xff]   ;;  %v3568_v3 = vld [vmem:[%s4548_s5 + $0x3a8] sm:$0xff]  }
 0x269   :  { %3300 = vmatpush3.bf16.msra.mxu0 %v3526_v2  ;;  %2825 = vmatprep.mubr.bf16.mxu0 %v1519_v1  ;;  %v1487_v8 = vpop.f32.mrf.mxu1  ;;  %v1516_v0 = vpack.c.bf16 %v1500_v62, %v1500_v62  ;;  %v3567_v2 = vld [vmem:[%s4548_s5 + $0x3e8] sm:$0xff]   ;;  %v3571_v61 = vld [vmem:[%s4548_s5 + $0x3d8] sm:$0xff]   ;;  %v3573_v56 = vld [vmem:[%s4548_s5 + $0x3d0] sm:$0xff]  }
 0x26a   :  { %3243 = vmatprep.subr.bf16.mxu1 %v3527_v6  ;;  %3301 = vmatprep.subr.bf16.mxu0 %v3528_v57  ;;  %v1496_v17 = vmax.f32 %v1320_v13, 0.0  ;;  %v1505_v54 = vmax.f32 %v1486_v49, 0.0  ;;  %v3569_v6 = vld [vmem:[%s4548_s5 + $0x3e0] sm:$0xff]   ;;  %v3574_v8 = vld [vmem:[%s4548_s5 + $0x390] sm:$0xff]  }
 0x26b   :  { %v1488_v60 = vpop.f32.mrf.mxu1  ;;  %v3570_v57 = vld [vmem:[%s4548_s5 + $0x3a0] sm:$0xff]  }
 0x26c   :  { %3244 = vmatpush3.bf16.msra.mxu1 %v3529_v7  ;;  %v1512_v24 = vpack.c.bf16 %v1496_v17, %v1496_v17  ;;  %v1521_v1 = vpack.c.bf16 %v1505_v54, %v1505_v54  ;;  %v3572_v7 = vld [vmem:[%s4548_s5 + $0x398] sm:$0xff]   ;;  %v1504_v60 = vmax.f32 %v4359_v5, 0.0 }
 0x26d   :  { %3302 = vmatpush3.bf16.msra.mxu0 %v3530_v9  ;;  %3245 = vmatprep.subr.bf16.mxu1 %v3531_v10  ;;  %v3575_v9 = vld [vmem:[%s4548_s5 + $0x3c8] sm:$0xff]  }
 0x26e   :  { %3303 = vmatprep.subr.bf16.mxu0 %v3532_v55  ;;  %v3576_v10 = vld [vmem:[%s4548_s5 + $0x388] sm:$0xff]   ;;  %v3578_v55 = vld [vmem:[%s4548_s5 + $0x380] sm:$0xff]   ;;  %s3604_s5 = smov [#allocation2]  }
 0x270   :  { %3246 = vmatpush3.bf16.msra.mxu1 %v3533_v12  ;;  %v1520_v12 = vpack.c.bf16 %v1504_v60, %v1504_v60 }
 0x271   :  { %3304 = vmatpush3.bf16.msra.mxu0 %v3534_v4  ;;  %3247 = vmatprep.subr.bf16.mxu1 %v3535_v31 }
 0x272   :  { %3305 = vmatprep.subr.bf16.mxu0 %v3536_v16 }
 0x274   :  { %3248 = vmatpush3.bf16.msra.mxu1 %v3537_v44 }
 0x275   :  { %3306 = vmatpush3.bf16.msra.mxu0 %v3538_v37  ;;  %3277 = vmatprep.subr.bf16.mxu1 %v3539_v19 }
 0x276   :  { %3307 = vmatprep.subr.bf16.mxu0 %v3540_v21  ;;  %v3003_v21 = vld [vmem:[%s4549_s6] ss:$0 sm:$0xff]  ;;  %s2887_s6 = sshll.u32 %s3604_s5, 4  ;;  %s2888_s6 = int_to_ptr.vmem [resolvable:$true] %s2887_s6 }
 0x277   :  { %2706 = vmatmul.mubr.bf16.vlgmr.msra.gmra.mxu1 %v1512_v24  ;;  %s3581_s22 = scalar_lea.vmem %s2888_s6, 32  ;;  %p3586_p1 = scmp.lt.s32.totalorder %s2888_s6, %s2888_s6 }
 0x278   :  { %3278 = vmatpush3.bf16.msra.mxu1 %v3541_v23  ;;  %2785 = vmatprep.mubr.bf16.mxu1 %v1517_v26  ;;  %p3582_p0 = scmp.ne.s32.totalorder %s2888_s6, %s3581_s22  ;;  %p3587_p2 = scmp.lt.s32.totalorder %s3581_s22, %s3581_s22 }
 0x279   :  { %3308 = vmatpush3.bf16.msra.mxu0 %v3542_v48  ;;  %3279 = vmatprep.subr.bf16.mxu1 %v3543_v25 }
 0x27a   :  { %3309 = vmatprep.subr.bf16.mxu0 %v3544_v27  ;;  %p3588_p3 = por %p3587_p2, %p3586_p1 }
 0x27c   :  { %3280 = vmatpush3.bf16.msra.mxu1 %v3545_v28  ;;  %p3589_p4 = pnand %p3588_p3, %p3582_p0 }
 0x27d   :  { %3310 = vmatpush3.bf16.msra.mxu0 %v3546_v29  ;;  %3281 = vmatprep.subr.bf16.mxu1 %v3547_v30 }
 0x27e   :  { %3311 = vmatprep.subr.bf16.mxu0 %v3548_v33 }
 0x280   :  { %3282 = vmatpush3.bf16.msra.mxu1 %v3549_v34 }
 0x281   :  { %3312 = vmatpush3.bf16.msra.mxu0 %v3550_v35  ;;  %3283 = vmatprep.subr.bf16.mxu1 %v3551_v51 }
 0x282   :  { %3313 = vmatprep.subr.bf16.mxu0 %v3552_v14 }
 0x284   :  { %3284 = vmatpush3.bf16.msra.mxu1 %v3553_v36 }
 0x285   :  { %3314 = vmatpush3.bf16.msra.mxu0 %v3554_v59  ;;  %3285 = vmatprep.subr.bf16.mxu1 %v3555_v38 }
 0x288   :  { %2826 = vmatmul.mubr.bf16.vlgmr.msra.gmra.mxu0 %v1518_v43  ;;  %3286 = vmatpush3.bf16.msra.mxu1 %v3556_v40 }
 0x289   :  { %3287 = vmatprep.subr.bf16.mxu1 %v3557_v18 }
 0x28c   :  { %3288 = vmatpush3.bf16.msra.mxu1 %v3558_v45 }
 0x28d   :  { %3289 = vmatprep.subr.bf16.mxu1 %v3559_v46 }
 0x290   :  { %3290 = vmatpush3.bf16.msra.mxu1 %v3560_v47 }
 0x291   :  { %3291 = vmatprep.subr.bf16.mxu1 %v3561_v42 }
 0x294   :  { %3292 = vmatpush3.bf16.msra.mxu1 %v3562_v50 }
 0x295   :  { %3321 = vmatprep.subr.bf16.mxu1 %v3563_v63 }
 0x297   :  { %2786 = vmatmul.mubr.bf16.vlgmr.msra.gmra.mxu1 %v1516_v0 }
 0x298   :  { %3322 = vmatpush3.bf16.msra.mxu1 %v3564_v22  ;;  %2865 = vmatprep.mubr.bf16.mxu1 %v1521_v1 }
 0x299   :  { %3323 = vmatprep.subr.bf16.mxu1 %v3565_v58 }
 0x29c   :  { %3324 = vmatpush3.bf16.msra.mxu1 %v3566_v52 }
 0x29d   :  { %3325 = vmatprep.subr.bf16.mxu1 %v3567_v2 }
 0x2a0   :  { %3326 = vmatpush3.bf16.msra.mxu1 %v3568_v3 }
 0x2a1   :  { %3327 = vmatprep.subr.bf16.mxu1 %v3569_v6 }
 0x2a4   :  { %3328 = vmatpush3.bf16.msra.mxu1 %v3570_v57 }
 0x2a5   :  { %3329 = vmatprep.subr.bf16.mxu1 %v3571_v61 }
 0x2a8   :  { %3330 = vmatpush3.bf16.msra.mxu1 %v3572_v7 }
 0x2a9   :  { %3331 = vmatprep.subr.bf16.mxu1 %v3573_v56 }
 0x2ac   :  { %3332 = vmatpush3.bf16.msra.mxu1 %v3574_v8 }
 0x2ad   :  { %3333 = vmatprep.subr.bf16.mxu1 %v3575_v9 }
 0x2b0   :  { %3334 = vmatpush3.bf16.msra.mxu1 %v3576_v10 }
 0x2b1   :  { %3335 = vmatprep.subr.bf16.mxu1 %v3577_v11 }
 0x2b4   :  { %3336 = vmatpush3.bf16.msra.mxu1 %v3578_v55 }
 0x2b7   :  { %2866 = vmatmul.mubr.bf16.vlgmr.msra.gmra.mxu1 %v1520_v12 }
 0x2f7   :  { %v3183_v13 = vpop.f32.mrf.mxu1 }
 0x2f9   :  { %v3184_v4 = vpop.f32.mrf.mxu1 }
 0x2fa   :  { %v3185_v31 = vadd.f32 %v3184_v4, %v3183_v13 }
 0x2fb   :  { %v3186_v15 = vpop.f32.mrf.mxu1 }
 0x2fc   :  { %v2588_v24 = vadd.f32 %v3185_v31, %v3003_v21 }
 0x2fd   :  { %v3187_v16 = vpop.f32.mrf.mxu1 }
 0x307   :  { %v3227_v44 = vpop.f32.mrf.mxu0 }
 0x309   :  { %v3228_v17 = vpop.f32.mrf.mxu0 }
 0x30a   :  { %v3229_v37 = vadd.f32 %v3228_v17, %v3227_v44 }
 0x30b   :  { %v3230_v19 = vpop.f32.mrf.mxu0 }
 0x30d   :  { %v3231_v20 = vpop.f32.mrf.mxu0 }
 0x317   :  { %v3205_v23 = vpop.f32.mrf.mxu1 }
 0x319   :  { %v3206_v5 = vpop.f32.mrf.mxu1 }
 0x31a   :  { %v3207_v48 = vadd.f32 %v3206_v5, %v3205_v23 }
 0x31b   :  { %v3208_v25 = vpop.f32.mrf.mxu1 }
 0x31c   :  { %v2628_v26 = vadd.f32 %v3207_v48, %v2588_v24 }
 0x31d   :  { %v3209_v27 = vpop.f32.mrf.mxu1 }
 0x31e   :  { %v2668_v28 = vadd.f32 %v3229_v37, %v2628_v26 }
 0x328   :  { %v3271_v29 = vpop.f32.mrf.mxu0 }
 0x32a   :  { %v3272_v30 = vpop.f32.mrf.mxu0 }
 0x32b   :  { %v3273_v32 = vadd.f32 %v3272_v30, %v3271_v29 }
 0x32c   :  { %v3274_v33 = vpop.f32.mrf.mxu0 }
 0x32e   :  { %v3275_v34 = vpop.f32.mrf.mxu0 }
 0x337   :  { %v3249_v35 = vpop.f32.mrf.mxu1 }
 0x339   :  { %v3250_v51 = vpop.f32.mrf.mxu1 }
 0x33a   :  { %v3251_v53 = vadd.f32 %v3250_v51, %v3249_v35 }
 0x33b   :  { %v3252_v14 = vpop.f32.mrf.mxu1 }
 0x33c   :  { %v2708_v36 = vadd.f32 %v3251_v53, %v2668_v28 }
 0x33d   :  { %v3253_v59 = vpop.f32.mrf.mxu1 }
 0x33e   :  { %v2748_v38 = vadd.f32 %v3273_v32, %v2708_v36 }
 0x348   :  { %v3315_v39 = vpop.f32.mrf.mxu0 }
 0x34a   :  { %v3316_v40 = vpop.f32.mrf.mxu0 }
 0x34b   :  { %v3317_v62 = vadd.f32 %v3316_v40, %v3315_v39 }
 0x34c   :  { %v3318_v18 = vpop.f32.mrf.mxu0 }
 0x34e   :  { %v3319_v43 = vpop.f32.mrf.mxu0 }
 0x357   :  { %v3293_v45 = vpop.f32.mrf.mxu1 }
 0x359   :  { %v3294_v46 = vpop.f32.mrf.mxu1 }
 0x35a   :  { %v3295_v42 = vadd.f32 %v3294_v46, %v3293_v45 }
 0x35b   :  { %v3296_v47 = vpop.f32.mrf.mxu1 }
 0x35c   :  { %v2788_v49 = vadd.f32 %v3295_v42, %v2748_v38 }
 0x35d   :  { %v3297_v41 = vpop.f32.mrf.mxu1 }
 0x35e   :  { %v2828_v54 = vadd.f32 %v3317_v62, %v2788_v49 }
 0x377   :  { %v3337_v50 = vpop.f32.mrf.mxu1 }
 0x379   :  { %v3338_v63 = vpop.f32.mrf.mxu1 }
 0x37a   :  { %v3339_v22 = vadd.f32 %v3338_v63, %v3337_v50 }
 0x37b   :  { %v3340_v0 = vpop.f32.mrf.mxu1 }
 0x37c   :  { %v2868_v58 = vadd.f32 %v3339_v22, %v2828_v54 }
 0x37d   :  { %v3341_v1 = vpop.f32.mrf.mxu1 }
 0x37e   :  { %v2873_v52 = vmul.f32 %v2868_v58, %v2868_v58 }
 0x380   :  { %v2874_v2 = vsel %vm376_vm0, %v2873_v52, 0.0 }
 0x381   :  { %2875 = vadd.xlane.f32.xlu0 %v2874_v2 }
 0x40a   :  { %v2876_v3 = vpop.xlane.xlu0 %2875 }
 0x40b   :  { %v2877_v6 = vmax.f32 %v2876_v3, 1e-24 }
 0x40d   :  { %3579 = vrsqrt.f32 %v2877_v6 }
 0x41a   :  { %v3580_v57 = vpop.eup %3579 }
 0x41b   :  { %v2879_v61 = vmul.f32 %v3580_v57, %v2868_v58 }
 0x41d   :  { %2880 = vst [vmem:[#allocation2] sm:$0x3] %v2879_v61 }
 0x41e   :  { %3592 = shalt.err (!%p3589_p4)
}
 0x41f   :  { %2890 = dma.vmem_to_hbm [thread:$0]  %s2888_s6, 32, %s4550_s7, [#allocation3]  }
 0x420   :  { %3601 = dma.done.wait [#allocation3], 32  }
 0x421   :  { %3602 = vsyncadd [#allocation3], 4294967264 }
 0x422   :  { %2894 = vsyncpa [#allocation3], 1 }

</bundles_post_ra>
